<compile_context>
chip_gen: v5e
topology: v5e:2x2
jax: 0.10.0
libtpu: 0.0.40
codegen_flags: <defaults>
</compile_context>

<pallas_src>
import functools
import math

import jax
import jax.numpy as jnp
from jax.experimental import pallas as pl
from jax.experimental.pallas import tpu as pltpu


_INV_SQRT2 = 0.7071067811865476


def _erf_approx(z):
    """Abramowitz & Stegun 7.1.26 rational approximation of erf.

    Max abs error ~1.5e-7 (below f32 noise for GELU purposes), built only from
    exp + basic VPU arithmetic so it lowers on every TPU generation.  PyTorch's
    F.gelu default is erf-exact; this matches it to ~1e-7 (no silent
    tanh-approx fallback anymore).
    """
    a1, a2, a3, a4, a5 = (0.254829592, -0.284496736, 1.421413741,
                          -1.453152027, 1.061405429)
    p = 0.3275911
    az = jnp.abs(z)
    t = 1.0 / (1.0 + p * az)
    poly = ((((a5 * t + a4) * t + a3) * t + a2) * t + a1) * t
    e = 1.0 - poly * jnp.exp(-az * az)
    return jnp.where(z < 0.0, -e, e)


def _gelu_exact(x):
    return 0.5 * x * (1.0 + _erf_approx(x * _INV_SQRT2))


# ----------------------------------------------------------------------------
# Kernel: one (batch, query-tile) pair per grid step.
# ----------------------------------------------------------------------------
def _rgt_layer_kernel(x_q_ref, x_full_ref, dm_ref, mask_ref, rel_ref,
                      wq_ref, wk_ref, wv_ref, bq_ref, bk_ref, bv_ref,
                      wo_ref, bo_ref, g1_ref, be1_ref,
                      w1_ref, b1_ref, w2_ref, b2_ref, g2_ref, be2_ref,
                      out_ref, k_scr, v_scr, ctx_scr, *,
                      num_heads, head_dim, num_buckets, max_range,
                      same_text_range, same_text_num, use_bf16):
    f32 = jnp.float32
    mm_dt = jnp.bfloat16 if use_bf16 else jnp.float32

    def mm(a, b):
        # MXU matmul: optional bf16 operands (2x MXU throughput), f32 accum.
        return jax.lax.dot_general(a.astype(mm_dt), b.astype(mm_dt),
                                   (((a.ndim - 1,), (0,)), ((), ())),
                                   preferred_element_type=f32)

    qi = pl.program_id(1)

    # --- K/V projections once per batch element; kept in VMEM scratch across
    # --- all query tiles of this batch element (query axis is "arbitrary").
    @pl.when(qi == 0)
    def _():
        xf = x_full_ref[0]                                   # (N, H)
        k_scr[...] = mm(xf, wk_ref[...]) + bk_ref[...]
        v_scr[...] = mm(xf, wv_ref[...]) + bv_ref[...]

    x_q = x_q_ref[0]                                         # (tq, H) f32
    q_all = mm(x_q, wq_ref[...]) + bq_ref[...]               # (tq, H) f32

    # --- distance-matrix bucketing, done in-kernel on the int32 tile (the big
    # --- f32 bias tensor never touches HBM).
    dmt = dm_ref[0]                                          # (tq, N) int32
    dm_b = jnp.where(dmt > same_text_num,
                     jnp.minimum(dmt + (max_range - same_text_num),
                                 same_text_range + max_range),
                     jnp.minimum(dmt, max_range))
    mask_add = mask_ref[0]                                   # (1, N) f32, -1e30 on padded keys
    rel = rel_ref[...]                                       # (num_buckets, num_heads) f32

    scale = f32(1.0 / math.sqrt(head_dim))
    # Static loop: num_heads is a small compile-time constant.  (A head grid
    # axis / fori_loop variant would need head-major layouts because
    # head_dim may be < 128 lanes.)
    for h in range(num_heads):
        lo = h * head_dim
        q_h = q_all[:, lo:lo + head_dim]                     # (tq, dh)
        k_h = k_scr[:, lo:lo + head_dim]                     # (N, dh)
        v_h = v_scr[:, lo:lo + head_dim]                     # (N, dh)
        s = jax.lax.dot_general(q_h.astype(mm_dt), k_h.astype(mm_dt),
                                (((1,), (1,)), ((), ())),
                                preferred_element_type=f32) * scale
        # Relative-position bias rebuilt in VMEM from the bucketized distances
        # and the tiny rel-pos table (bucket compare/select chain).
        bias_h = jnp.zeros_like(s)
        for bkt in range(num_buckets):
            bias_h = jnp.where(dm_b == bkt, rel[bkt:bkt + 1, h:h + 1], bias_h)
        s = s + bias_h + mask_add                            # logits stay f32
        m = jnp.max(s, axis=-1, keepdims=True)
        p = jnp.exp(s - m)
        denom = jnp.sum(p, axis=-1, keepdims=True)
        ctx_h = mm(p, v_h)                                   # (tq, dh) f32 accum
        # Normalise after p@v: tq*dh multiplies instead of tq*N divides.
        ctx_h = ctx_h * pl.reciprocal(denom, approx=use_bf16)
        ctx_scr[:, lo:lo + head_dim] = ctx_h

    # --- single (tq,H)@(H,H) out-projection over the concatenated heads.
    attn = mm(ctx_scr[...], wo_ref[...]) + bo_ref[...]

    # --- residual + LayerNorm1 (module explicitly sets eps=1e-6).
    src = x_q + attn
    mu = jnp.mean(src, axis=-1, keepdims=True)
    var = jnp.mean(jnp.square(src - mu), axis=-1, keepdims=True)
    src = (src - mu) * jax.lax.rsqrt(var + 1e-6) * g1_ref[...] + be1_ref[...]

    # --- feed-forward: linear1 -> erf-exact GELU -> linear2.
    h1 = mm(src, w1_ref[...]) + b1_ref[...]
    h1 = _gelu_exact(h1)
    h2 = mm(h1, w2_ref[...]) + b2_ref[...]

    # --- residual + LayerNorm2.
    src2 = src + h2
    mu2 = jnp.mean(src2, axis=-1, keepdims=True)
    var2 = jnp.mean(jnp.square(src2 - mu2), axis=-1, keepdims=True)
    out_ref[0] = ((src2 - mu2) * jax.lax.rsqrt(var2 + 1e-6) * g2_ref[...]
                  + be2_ref[...]).astype(out_ref.dtype)


# ----------------------------------------------------------------------------
# Wrapper: one-time weight re-layout + pallas_call.
# ----------------------------------------------------------------------------
def _round_up(x, m):
    return -(-x // m) * m


def _tile_bytes(shape, dtype):
    shape = tuple(int(d) for d in shape)
    if len(shape) < 2:
        shape = (1,) * (2 - len(shape)) + shape
    item = jnp.dtype(dtype).itemsize
    sublane = 8 if item >= 4 else (32 // item)
    lead = 1
    for d in shape[:-2]:
        lead *= d
    return lead * _round_up(shape[-2], sublane) * _round_up(shape[-1], 128) * item


def rgt_encoder_layer(node_features, distance_matrix, padding_mask, params, *,
                      num_heads, num_graph_pos, same_text_range, same_text_num,
                      q_block=None, use_bf16=False):
    """One RelativeGraphTransformerEncoderLayer forward (post-norm, eval)."""
    B, N, H = node_features.shape
    assert H % num_heads == 0
    head_dim = H // num_heads
    max_range = num_graph_pos - 1

    if q_block is None:
        q_block = N if N <= 128 else 128
    assert N % q_block == 0 and (q_block == N or q_block % 8 == 0)
    nq = N // q_block

    f32 = jnp.float32
    wdt = jnp.bfloat16 if use_bf16 else f32

    # One-time host-side re-layout: split fused in_proj into Q/K/V blocks and
    # transpose PyTorch (out,in) weights so the kernel contracts
    # last-dim-of-LHS x first-dim-of-RHS (no per-grid-step transposes).
    w_in = params["w_in"].astype(f32)
    b_in = params["b_in"].reshape(-1).astype(f32)
    wq = w_in[0 * H:1 * H].T.astype(wdt)
    wk = w_in[1 * H:2 * H].T.astype(wdt)
    wv = w_in[2 * H:3 * H].T.astype(wdt)
    bq = b_in[0 * H:1 * H].reshape(1, H)
    bk = b_in[1 * H:2 * H].reshape(1, H)
    bv = b_in[2 * H:3 * H].reshape(1, H)
    wo = params["w_out"].astype(f32).T.astype(wdt)           # (H, H)
    bo = params["b_out"].reshape(1, H).astype(f32)
    w1 = params["w1"].astype(f32).T.astype(wdt)              # (H, F)
    b1 = params["b1"].reshape(1, -1).astype(f32)
    w2 = params["w2"].astype(f32).T.astype(wdt)              # (F, H)
    b2 = params["b2"].reshape(1, H).astype(f32)
    g1 = params["g1"].reshape(1, H).astype(f32)
    be1 = params["be1"].reshape(1, H).astype(f32)
    g2 = params["g2"].reshape(1, H).astype(f32)
    be2 = params["be2"].reshape(1, H).astype(f32)
    rel_pos = params["rel_pos"].astype(f32)                  # (num_buckets, nH)
    num_buckets = int(rel_pos.shape[0])

    x = node_features.astype(f32)
    dm = distance_matrix.astype(jnp.int32)
    # key_padding_mask: True = padded key -> large negative additive logit (f32).
    mask_add = jnp.where(padding_mask, f32(-1e30), f32(0.0)).reshape(B, 1, N)

    weights = (wq, wk, wv, bq, bk, bv, wo, bo, g1, be1, w1, b1, w2, b2, g2, be2)

    in_specs = [
        pl.BlockSpec((1, q_block, H), lambda b, q: (b, q, 0)),   # x, query tile
        pl.BlockSpec((1, N, H), lambda b, q: (b, 0, 0)),          # x, full (K/V proj)
        pl.BlockSpec((1, q_block, N), lambda b, q: (b, q, 0)),    # int32 distances
        pl.BlockSpec((1, 1, N), lambda b, q: (b, 0, 0)),          # key-pad mask
        pl.BlockSpec((num_buckets, num_heads), lambda b, q: (0, 0)),  # rel-pos table
    ] + [pl.BlockSpec(w.shape, lambda b, q: (0, 0)) for w in weights]

    scratch_shapes = [
        pltpu.VMEM((N, H), f32),        # K, resident across query tiles
        pltpu.VMEM((N, H), f32),        # V
        pltpu.VMEM((q_block, H), f32),  # per-head contexts (lane-concatenated)
    ]

    # Explicit scoped-VMEM budget: streamed blocks (x2 double-buffer) + weights
    # (x2, conservative) + scratch + headroom.
    streamed = [((1, q_block, H), f32), ((1, N, H), f32),
                ((1, q_block, N), jnp.int32), ((1, 1, N), f32),
                ((num_buckets, num_heads), f32), ((1, q_block, H), f32)]
    est = (2 * sum(_tile_bytes(s, d) for s, d in streamed)
           + 2 * sum(_tile_bytes(w.shape, w.dtype) for w in weights)
           + 2 * _tile_bytes((N, H), f32) + _tile_bytes((q_block, H), f32)
           + (4 << 20))
    vmem_limit = int(min(max(est, 8 << 20), 128 << 20))

    kernel = functools.partial(
        _rgt_layer_kernel, num_heads=num_heads, head_dim=head_dim,
        num_buckets=num_buckets, max_range=max_range,
        same_text_range=same_text_range, same_text_num=same_text_num,
        use_bf16=use_bf16)

    return pl.pallas_call(
        kernel,
        out_shape=jax.ShapeDtypeStruct((B, N, H), f32),
        grid_spec=pltpu.PrefetchScalarGridSpec(
            num_scalar_prefetch=0,
            grid=(B, nq),
            in_specs=in_specs,
            out_specs=pl.BlockSpec((1, q_block, H), lambda b, q: (b, q, 0)),
            scratch_shapes=scratch_shapes),
        compiler_params=pltpu.CompilerParams(
            # batch axis independent -> megacore sharding on multi-TC chips;
            # query-tile axis sequential (reuses the per-batch K/V scratch).
            dimension_semantics=("parallel", "arbitrary"),
            vmem_limit_bytes=vmem_limit),
    )(x, x, dm, mask_add, rel_pos, *weights)


def rgt_encoder(node_features, distance_matrix, padding_mask, layer_params, *,
                num_heads, num_graph_pos, same_text_range, same_text_num,
                final_norm=None, q_block=None, use_bf16=False):
    """RelativeGraphTransformerEncoder.forward with gru_combine=False."""
    x = node_features
    for p in layer_params:
        x = rgt_encoder_layer(x, distance_matrix, padding_mask, p,
                              num_heads=num_heads, num_graph_pos=num_graph_pos,
                              same_text_range=same_text_range,
                              same_text_num=same_text_num,
                              q_block=q_block, use_bf16=use_bf16)
    if final_norm is not None:   # optional encoder-level LayerNorm (plain JAX)
        g, b = final_norm
        mu = x.mean(-1, keepdims=True)
        var = jnp.square(x - mu).mean(-1, keepdims=True)
        x = (x - mu) * jax.lax.rsqrt(var + 1e-5) * g + b
    return x


# ----------------------------------------------------------------------------
# Pure-JAX reference (mirrors the PyTorch forward) for the correctness check.
# ----------------------------------------------------------------------------
def _reference_layer(x, distance_matrix, padding_mask, params, *, num_heads,
                     num_graph_pos, same_text_range, same_text_num):
    B, N, H = x.shape
    hd = H // num_heads
    max_range = num_graph_pos - 1
    dm = jnp.where(distance_matrix > same_text_num,
                   jnp.minimum(distance_matrix + max_range - same_text_num,
                               same_text_range + max_range),
                   jnp.minimum(distance_matrix, max_range))
    bias = jnp.transpose(params["rel_pos"][dm], (0, 3, 1, 2))      # (B,nH,N,N)
    mask_add = jnp.where(padding_mask, -1e30, 0.0)[:, None, None, :]

    qkv = jnp.einsum("bnh,gh->bng", x, params["w_in"]) + params["b_in"]
    q, k, v = jnp.split(qkv, 3, axis=-1)
    sh = lambda t: t.reshape(B, N, num_heads, hd).transpose(0, 2, 1, 3)
    q, k, v = sh(q), sh(k), sh(v)
    s = jnp.einsum("bhqd,bhkd->bhqk", q, k) / math.sqrt(hd) + bias + mask_add
    p = jax.nn.softmax(s, axis=-1)
    ctx = jnp.einsum("bhqk,bhkd->bhqd", p, v).transpose(0, 2, 1, 3).reshape(B, N, H)
    attn = jnp.einsum("bnh,oh->bno", ctx, params["w_out"]) + params["b_out"]

    def ln(t, g, b):
        mu = t.mean(-1, keepdims=True)
        var = jnp.square(t - mu).mean(-1, keepdims=True)
        return (t - mu) * jax.lax.rsqrt(var + 1e-6) * g + b

    src = ln(x + attn, params["g1"], params["be1"])
    h1 = jnp.einsum("bnh,fh->bnf", src, params["w1"]) + params["b1"]
    h1 = 0.5 * h1 * (1.0 + jax.lax.erf(h1 / math.sqrt(2.0)))       # exact GELU
    h2 = jnp.einsum("bnf,hf->bnh", h1, params["w2"]) + params["b2"]
    return ln(src + h2, params["g2"], params["be2"])


def _reference_encoder(x, dm, mask, layer_params, **cfg):
    for p in layer_params:
        x = _reference_layer(x, dm, mask, p, **cfg)
    return x


if __name__ == "__main__":
    B, N, H = 2, 16, 32
    num_heads, dim_ff = 4, 64
    num_graph_pos, same_text_range, same_text_num = 8, 4, 50
    num_layers = 2

    key = jax.random.PRNGKey(0)

    def init(k, shape, scale=0.05):
        return (scale * jax.random.normal(k, shape)).astype(jnp.float32)

    def make_layer_params(k):
        ks = jax.random.split(k, 9)
        return {
            "w_in":  init(ks[0], (3 * H, H)),
            "b_in":  init(ks[1], (3 * H,)),
            "w_out": init(ks[2], (H, H)),
            "b_out": init(ks[3], (H,)),
            "g1":    jnp.ones((H,), jnp.float32),
            "be1":   jnp.zeros((H,), jnp.float32),
            "w1":    init(ks[4], (dim_ff, H)),
            "b1":    init(ks[5], (dim_ff,)),
            "w2":    init(ks[6], (H, dim_ff)),
            "b2":    init(ks[7], (H,)),
            "g2":    jnp.ones((H,), jnp.float32),
            "be2":   jnp.zeros((H,), jnp.float32),
            "rel_pos": init(ks[8], (num_graph_pos + same_text_range, num_heads), 0.1),
        }

    k_layers, k_x, k_dm = jax.random.split(key, 3)
    layer_params = [make_layer_params(k)
                    for k in jax.random.split(k_layers, num_layers)]
    node_features = init(k_x, (B, N, H), 1.0)
    distance_matrix = jax.random.randint(k_dm, (B, N, N), 0, 60).astype(jnp.int32)
    # True = padded node (key_padding_mask convention of nn.MultiheadAttention).
    padding_mask = jnp.arange(N)[None, :] >= jnp.array([N, N - 3])[:, None]

    cfg = dict(num_heads=num_heads, num_graph_pos=num_graph_pos,
               same_text_range=same_text_range, same_text_num=same_text_num)

    ref = _reference_encoder(node_features, distance_matrix, padding_mask,
                             layer_params, **cfg)
    jax.block_until_ready(ref)

    # f32 path: strict check against the PyTorch-equivalent reference.
    out = rgt_encoder(node_features, distance_matrix, padding_mask,
                      layer_params, q_block=8, use_bf16=False, **cfg)
    jax.block_until_ready(out)
    assert out.shape == (B, N, H) and out.dtype == jnp.float32
    err = float(jnp.max(jnp.abs(out - ref)))
    assert err < 5e-4, f"f32 kernel max abs err {err}"

    # bf16-matmul fast path (f32 accumulation, f32 softmax/LayerNorm stats,
    # f32 key-mask logits): looser tolerance, bf16 mantissa ~3 decimal digits.
    out_bf16 = rgt_encoder(node_features, distance_matrix, padding_mask,
                           layer_params, q_block=8, use_bf16=True, **cfg)
    jax.block_until_ready(out_bf16)
    err_bf16 = float(jnp.max(jnp.abs(out_bf16 - ref)))
    assert err_bf16 < 1e-1, f"bf16 kernel max abs err {err_bf16}"

    print("KERNEL_OK")
</pallas_src>

<mosaic_0001>
module attributes {stable_mosaic.version = 11 : i64} {
  func.func @_rgt_layer_kernel(%arg0: i32, %arg1: i32, %arg2: memref<1x8x32xf32, #tpu.memory_space<vmem>>, %arg3: memref<1x16x32xf32, #tpu.memory_space<vmem>>, %arg4: memref<1x8x16xi32, #tpu.memory_space<vmem>>, %arg5: memref<1x1x16xf32, #tpu.memory_space<vmem>>, %arg6: memref<12x4xf32, #tpu.memory_space<vmem>>, %arg7: memref<32x32xf32, #tpu.memory_space<vmem>>, %arg8: memref<32x32xf32, #tpu.memory_space<vmem>>, %arg9: memref<32x32xf32, #tpu.memory_space<vmem>>, %arg10: memref<1x32xf32, #tpu.memory_space<vmem>>, %arg11: memref<1x32xf32, #tpu.memory_space<vmem>>, %arg12: memref<1x32xf32, #tpu.memory_space<vmem>>, %arg13: memref<32x32xf32, #tpu.memory_space<vmem>>, %arg14: memref<1x32xf32, #tpu.memory_space<vmem>>, %arg15: memref<1x32xf32, #tpu.memory_space<vmem>>, %arg16: memref<1x32xf32, #tpu.memory_space<vmem>>, %arg17: memref<32x64xf32, #tpu.memory_space<vmem>>, %arg18: memref<1x64xf32, #tpu.memory_space<vmem>>, %arg19: memref<64x32xf32, #tpu.memory_space<vmem>>, %arg20: memref<1x32xf32, #tpu.memory_space<vmem>>, %arg21: memref<1x32xf32, #tpu.memory_space<vmem>>, %arg22: memref<1x32xf32, #tpu.memory_space<vmem>>, %arg23: memref<1x8x32xf32, #tpu.memory_space<vmem>>, %arg24: memref<16x32xf32, #tpu.memory_space<vmem>>, %arg25: memref<16x32xf32, #tpu.memory_space<vmem>>, %arg26: memref<8x32xf32, #tpu.memory_space<vmem>>) attributes {dimension_semantics = [#tpu.dimension_semantics<parallel>, #tpu.dimension_semantics<arbitrary>], iteration_bounds = array<i64: 2, 2>, scalar_prefetch = 0 : i64, scratch_operands = 3 : i64, tpu.core_type = #tpu.core_type<tc>, window_params = [{transform_indices = @transform_0, window_bounds = array<i64: 1, 8, 32>}, {transform_indices = @transform_1, window_bounds = array<i64: 1, 16, 32>}, {transform_indices = @transform_2, window_bounds = array<i64: 1, 8, 16>}, {transform_indices = @transform_3, window_bounds = array<i64: 1, 1, 16>}, {pipeline_mode = #tpu.pipeline_mode<synchronous>, transform_indices = @transform_4, window_bounds = array<i64: 12, 4>}, {pipeline_mode = #tpu.pipeline_mode<synchronous>, transform_indices = @transform_5, window_bounds = array<i64: 32, 32>}, {pipeline_mode = #tpu.pipeline_mode<synchronous>, transform_indices = @transform_6, window_bounds = array<i64: 32, 32>}, {pipeline_mode = #tpu.pipeline_mode<synchronous>, transform_indices = @transform_7, window_bounds = array<i64: 32, 32>}, {pipeline_mode = #tpu.pipeline_mode<synchronous>, transform_indices = @transform_8, window_bounds = array<i64: 1, 32>}, {pipeline_mode = #tpu.pipeline_mode<synchronous>, transform_indices = @transform_9, window_bounds = array<i64: 1, 32>}, {pipeline_mode = #tpu.pipeline_mode<synchronous>, transform_indices = @transform_10, window_bounds = array<i64: 1, 32>}, {pipeline_mode = #tpu.pipeline_mode<synchronous>, transform_indices = @transform_11, window_bounds = array<i64: 32, 32>}, {pipeline_mode = #tpu.pipeline_mode<synchronous>, transform_indices = @transform_12, window_bounds = array<i64: 1, 32>}, {pipeline_mode = #tpu.pipeline_mode<synchronous>, transform_indices = @transform_13, window_bounds = array<i64: 1, 32>}, {pipeline_mode = #tpu.pipeline_mode<synchronous>, transform_indices = @transform_14, window_bounds = array<i64: 1, 32>}, {pipeline_mode = #tpu.pipeline_mode<synchronous>, transform_indices = @transform_15, window_bounds = array<i64: 32, 64>}, {pipeline_mode = #tpu.pipeline_mode<synchronous>, transform_indices = @transform_16, window_bounds = array<i64: 1, 64>}, {pipeline_mode = #tpu.pipeline_mode<synchronous>, transform_indices = @transform_17, window_bounds = array<i64: 64, 32>}, {pipeline_mode = #tpu.pipeline_mode<synchronous>, transform_indices = @transform_18, window_bounds = array<i64: 1, 32>}, {pipeline_mode = #tpu.pipeline_mode<synchronous>, transform_indices = @transform_19, window_bounds = array<i64: 1, 32>}, {pipeline_mode = #tpu.pipeline_mode<synchronous>, transform_indices = @transform_20, window_bounds = array<i64: 1, 32>}, {transform_indices = @transform_21, window_bounds = array<i64: 1, 8, 32>}]} {
    %c0_i32 = arith.constant 0 : i32
    %0 = arith.cmpi eq, %arg1, %c0_i32 : i32
    %1 = arith.extui %0 : i1 to i32
    %c0_i32_0 = arith.constant 0 : i32
    %2 = arith.cmpi ne, %1, %c0_i32_0 : i32
    scf.if %2 {
      %c0_152 = arith.constant 0 : index
      %c0_153 = arith.constant 0 : index
      %c0_154 = arith.constant 0 : index
      %509 = vector.load %arg3[%c0_152, %c0_153, %c0_154] : memref<1x16x32xf32, #tpu.memory_space<vmem>>, vector<1x16x32xf32>
      %510 = vector.shape_cast %509 : vector<1x16x32xf32> to vector<16x32xf32>
      %c0_155 = arith.constant 0 : index
      %c0_156 = arith.constant 0 : index
      %511 = vector.load %arg8[%c0_155, %c0_156] : memref<32x32xf32, #tpu.memory_space<vmem>>, vector<32x32xf32>
      %cst_157 = arith.constant dense<0.000000e+00> : vector<16x32xf32>
      %512 = tpu.matmul %510, %511, %cst_157 {dimension_numbers = #tpu.dot_dimension_numbers<[1], [0], [0], [1], [0, 0, 1, 1], [], []>} : vector<16x32xf32>, vector<32x32xf32>, vector<16x32xf32> -> vector<16x32xf32>
      %c0_158 = arith.constant 0 : index
      %c0_159 = arith.constant 0 : index
      %513 = vector.load %arg11[%c0_158, %c0_159] : memref<1x32xf32, #tpu.memory_space<vmem>>, vector<1x32xf32>
      %514 = vector.broadcast %513 : vector<1x32xf32> to vector<16x32xf32>
      %515 = arith.addf %512, %514 : vector<16x32xf32>
      %c0_160 = arith.constant 0 : index
      %c0_161 = arith.constant 0 : index
      %516 = vector.load %arg24[%c0_160, %c0_161] : memref<16x32xf32, #tpu.memory_space<vmem>>, vector<16x32xf32>
      tpu.vector_store %arg24[%c0_160, %c0_161], %515 {strides = array<i32>} : memref<16x32xf32, #tpu.memory_space<vmem>>, vector<16x32xf32>,
      %c0_162 = arith.constant 0 : index
      %c0_163 = arith.constant 0 : index
      %517 = vector.load %arg9[%c0_162, %c0_163] : memref<32x32xf32, #tpu.memory_space<vmem>>, vector<32x32xf32>
      %cst_164 = arith.constant dense<0.000000e+00> : vector<16x32xf32>
      %518 = tpu.matmul %510, %517, %cst_164 {dimension_numbers = #tpu.dot_dimension_numbers<[1], [0], [0], [1], [0, 0, 1, 1], [], []>} : vector<16x32xf32>, vector<32x32xf32>, vector<16x32xf32> -> vector<16x32xf32>
      %c0_165 = arith.constant 0 : index
      %c0_166 = arith.constant 0 : index
      %519 = vector.load %arg12[%c0_165, %c0_166] : memref<1x32xf32, #tpu.memory_space<vmem>>, vector<1x32xf32>
      %520 = vector.broadcast %519 : vector<1x32xf32> to vector<16x32xf32>
      %521 = arith.addf %518, %520 : vector<16x32xf32>
      %c0_167 = arith.constant 0 : index
      %c0_168 = arith.constant 0 : index
      %522 = vector.load %arg25[%c0_167, %c0_168] : memref<16x32xf32, #tpu.memory_space<vmem>>, vector<16x32xf32>
      tpu.vector_store %arg25[%c0_167, %c0_168], %521 {strides = array<i32>} : memref<16x32xf32, #tpu.memory_space<vmem>>, vector<16x32xf32>,
    } else {
    }
    %c0 = arith.constant 0 : index
    %c0_1 = arith.constant 0 : index
    %c0_2 = arith.constant 0 : index
    %3 = vector.load %arg2[%c0, %c0_1, %c0_2] : memref<1x8x32xf32, #tpu.memory_space<vmem>>, vector<1x8x32xf32>
    %4 = vector.shape_cast %3 : vector<1x8x32xf32> to vector<8x32xf32>
    %c0_3 = arith.constant 0 : index
    %c0_4 = arith.constant 0 : index
    %5 = vector.load %arg7[%c0_3, %c0_4] : memref<32x32xf32, #tpu.memory_space<vmem>>, vector<32x32xf32>
    %cst = arith.constant dense<0.000000e+00> : vector<8x32xf32>
    %6 = tpu.matmul %4, %5, %cst {dimension_numbers = #tpu.dot_dimension_numbers<[1], [0], [0], [1], [0, 0, 1, 1], [], []>} : vector<8x32xf32>, vector<32x32xf32>, vector<8x32xf32> -> vector<8x32xf32>
    %c0_5 = arith.constant 0 : index
    %c0_6 = arith.constant 0 : index
    %7 = vector.load %arg10[%c0_5, %c0_6] : memref<1x32xf32, #tpu.memory_space<vmem>>, vector<1x32xf32>
    %8 = vector.broadcast %7 : vector<1x32xf32> to vector<8x32xf32>
    %9 = arith.addf %6, %8 : vector<8x32xf32>
    %c0_7 = arith.constant 0 : index
    %c0_8 = arith.constant 0 : index
    %c0_9 = arith.constant 0 : index
    %10 = vector.load %arg4[%c0_7, %c0_8, %c0_9] : memref<1x8x16xi32, #tpu.memory_space<vmem>>, vector<1x8x16xi32>
    %11 = vector.shape_cast %10 : vector<1x8x16xi32> to vector<8x16xi32>
    %c50_i32 = arith.constant 50 : i32
    %12 = vector.broadcast %c50_i32 : i32 to vector<8x16xi32>
    %13 = arith.cmpi sgt, %11, %12 : vector<8x16xi32>
    %c-43_i32 = arith.constant -43 : i32
    %14 = vector.broadcast %c-43_i32 : i32 to vector<8x16xi32>
    %15 = arith.addi %11, %14 : vector<8x16xi32>
    %c11_i32 = arith.constant 11 : i32
    %16 = vector.broadcast %c11_i32 : i32 to vector<8x16xi32>
    %17 = arith.minsi %15, %16 : vector<8x16xi32>
    %c7_i32 = arith.constant 7 : i32
    %18 = vector.broadcast %c7_i32 : i32 to vector<8x16xi32>
    %19 = arith.minsi %11, %18 : vector<8x16xi32>
    %20 = arith.select %13, %17, %19 : vector<8x16xi1>, vector<8x16xi32>
    %c0_10 = arith.constant 0 : index
    %c0_11 = arith.constant 0 : index
    %c0_12 = arith.constant 0 : index
    %21 = vector.load %arg5[%c0_10, %c0_11, %c0_12] : memref<1x1x16xf32, #tpu.memory_space<vmem>>, vector<1x1x16xf32>
    %22 = vector.shape_cast %21 : vector<1x1x16xf32> to vector<1x16xf32>
    %c0_13 = arith.constant 0 : index
    %c0_14 = arith.constant 0 : index
    %23 = vector.load %arg6[%c0_13, %c0_14] : memref<12x4xf32, #tpu.memory_space<vmem>>, vector<12x4xf32>
    %24 = vector.extract_strided_slice %9 {offsets = [0, 0], sizes = [8, 8], strides = [1, 1]} : vector<8x32xf32> to vector<8x8xf32>
    %c0_15 = arith.constant 0 : index
    %c0_16 = arith.constant 0 : index
    %25 = vector.load %arg24[%c0_15, %c0_16] : memref<16x32xf32, #tpu.memory_space<vmem>>, vector<16x8xf32>
    %c0_17 = arith.constant 0 : index
    %c0_18 = arith.constant 0 : index
    %26 = vector.load %arg25[%c0_17, %c0_18] : memref<16x32xf32, #tpu.memory_space<vmem>>, vector<16x8xf32>
    %cst_19 = arith.constant dense<0.000000e+00> : vector<8x16xf32>
    %27 = tpu.matmul %24, %25, %cst_19 {dimension_numbers = #tpu.dot_dimension_numbers<[1], [1], [0], [0], [0, 0, 1, 0], [], []>} : vector<8x8xf32>, vector<16x8xf32>, vector<8x16xf32> -> vector<8x16xf32>
    %cst_20 = arith.constant 0.353553385 : f32
    %28 = vector.broadcast %cst_20 : f32 to vector<8x16xf32>
    %29 = arith.mulf %27, %28 : vector<8x16xf32>
    %cst_21 = arith.constant 0.000000e+00 : f32
    %30 = vector.broadcast %cst_21 : f32 to vector<8x16xf32>
    %c0_i32_22 = arith.constant 0 : i32
    %31 = vector.broadcast %c0_i32_22 : i32 to vector<8x16xi32>
    %32 = arith.cmpi eq, %20, %31 : vector<8x16xi32>
    %33 = vector.extract_strided_slice %23 {offsets = [0, 0], sizes = [1, 1], strides = [1, 1]} : vector<12x4xf32> to vector<1x1xf32>
    %34 = vector.shape_cast %33 : vector<1x1xf32> to vector<1x1xf32>
    %35 = vector.broadcast %34 : vector<1x1xf32> to vector<8x16xf32>
    %36 = arith.select %32, %35, %30 : vector<8x16xi1>, vector<8x16xf32>
    %c1_i32 = arith.constant 1 : i32
    %37 = vector.broadcast %c1_i32 : i32 to vector<8x16xi32>
    %38 = arith.cmpi eq, %20, %37 : vector<8x16xi32>
    %39 = vector.extract_strided_slice %23 {offsets = [1, 0], sizes = [1, 1], strides = [1, 1]} : vector<12x4xf32> to vector<1x1xf32>
    %40 = vector.shape_cast %39 : vector<1x1xf32> to vector<1x1xf32>
    %41 = vector.broadcast %40 : vector<1x1xf32> to vector<8x16xf32>
    %42 = arith.select %38, %41, %36 : vector<8x16xi1>, vector<8x16xf32>
    %c2_i32 = arith.constant 2 : i32
    %43 = vector.broadcast %c2_i32 : i32 to vector<8x16xi32>
    %44 = arith.cmpi eq, %20, %43 : vector<8x16xi32>
    %45 = vector.extract_strided_slice %23 {offsets = [2, 0], sizes = [1, 1], strides = [1, 1]} : vector<12x4xf32> to vector<1x1xf32>
    %46 = vector.shape_cast %45 : vector<1x1xf32> to vector<1x1xf32>
    %47 = vector.broadcast %46 : vector<1x1xf32> to vector<8x16xf32>
    %48 = arith.select %44, %47, %42 : vector<8x16xi1>, vector<8x16xf32>
    %c3_i32 = arith.constant 3 : i32
    %49 = vector.broadcast %c3_i32 : i32 to vector<8x16xi32>
    %50 = arith.cmpi eq, %20, %49 : vector<8x16xi32>
    %51 = vector.extract_strided_slice %23 {offsets = [3, 0], sizes = [1, 1], strides = [1, 1]} : vector<12x4xf32> to vector<1x1xf32>
    %52 = vector.shape_cast %51 : vector<1x1xf32> to vector<1x1xf32>
    %53 = vector.broadcast %52 : vector<1x1xf32> to vector<8x16xf32>
    %54 = arith.select %50, %53, %48 : vector<8x16xi1>, vector<8x16xf32>
    %c4_i32 = arith.constant 4 : i32
    %55 = vector.broadcast %c4_i32 : i32 to vector<8x16xi32>
    %56 = arith.cmpi eq, %20, %55 : vector<8x16xi32>
    %57 = vector.extract_strided_slice %23 {offsets = [4, 0], sizes = [1, 1], strides = [1, 1]} : vector<12x4xf32> to vector<1x1xf32>
    %58 = vector.shape_cast %57 : vector<1x1xf32> to vector<1x1xf32>
    %59 = vector.broadcast %58 : vector<1x1xf32> to vector<8x16xf32>
    %60 = arith.select %56, %59, %54 : vector<8x16xi1>, vector<8x16xf32>
    %c5_i32 = arith.constant 5 : i32
    %61 = vector.broadcast %c5_i32 : i32 to vector<8x16xi32>
    %62 = arith.cmpi eq, %20, %61 : vector<8x16xi32>
    %63 = vector.extract_strided_slice %23 {offsets = [5, 0], sizes = [1, 1], strides = [1, 1]} : vector<12x4xf32> to vector<1x1xf32>
    %64 = vector.shape_cast %63 : vector<1x1xf32> to vector<1x1xf32>
    %65 = vector.broadcast %64 : vector<1x1xf32> to vector<8x16xf32>
    %66 = arith.select %62, %65, %60 : vector<8x16xi1>, vector<8x16xf32>
    %c6_i32 = arith.constant 6 : i32
    %67 = vector.broadcast %c6_i32 : i32 to vector<8x16xi32>
    %68 = arith.cmpi eq, %20, %67 : vector<8x16xi32>
    %69 = vector.extract_strided_slice %23 {offsets = [6, 0], sizes = [1, 1], strides = [1, 1]} : vector<12x4xf32> to vector<1x1xf32>
    %70 = vector.shape_cast %69 : vector<1x1xf32> to vector<1x1xf32>
    %71 = vector.broadcast %70 : vector<1x1xf32> to vector<8x16xf32>
    %72 = arith.select %68, %71, %66 : vector<8x16xi1>, vector<8x16xf32>
    %c7_i32_23 = arith.constant 7 : i32
    %73 = vector.broadcast %c7_i32_23 : i32 to vector<8x16xi32>
    %74 = arith.cmpi eq, %20, %73 : vector<8x16xi32>
    %75 = vector.extract_strided_slice %23 {offsets = [7, 0], sizes = [1, 1], strides = [1, 1]} : vector<12x4xf32> to vector<1x1xf32>
    %76 = vector.shape_cast %75 : vector<1x1xf32> to vector<1x1xf32>
    %77 = vector.broadcast %76 : vector<1x1xf32> to vector<8x16xf32>
    %78 = arith.select %74, %77, %72 : vector<8x16xi1>, vector<8x16xf32>
    %c8_i32 = arith.constant 8 : i32
    %79 = vector.broadcast %c8_i32 : i32 to vector<8x16xi32>
    %80 = arith.cmpi eq, %20, %79 : vector<8x16xi32>
    %81 = vector.extract_strided_slice %23 {offsets = [8, 0], sizes = [1, 1], strides = [1, 1]} : vector<12x4xf32> to vector<1x1xf32>
    %82 = vector.shape_cast %81 : vector<1x1xf32> to vector<1x1xf32>
    %83 = vector.broadcast %82 : vector<1x1xf32> to vector<8x16xf32>
    %84 = arith.select %80, %83, %78 : vector<8x16xi1>, vector<8x16xf32>
    %c9_i32 = arith.constant 9 : i32
    %85 = vector.broadcast %c9_i32 : i32 to vector<8x16xi32>
    %86 = arith.cmpi eq, %20, %85 : vector<8x16xi32>
    %87 = vector.extract_strided_slice %23 {offsets = [9, 0], sizes = [1, 1], strides = [1, 1]} : vector<12x4xf32> to vector<1x1xf32>
    %88 = vector.shape_cast %87 : vector<1x1xf32> to vector<1x1xf32>
    %89 = vector.broadcast %88 : vector<1x1xf32> to vector<8x16xf32>
    %90 = arith.select %86, %89, %84 : vector<8x16xi1>, vector<8x16xf32>
    %c10_i32 = arith.constant 10 : i32
    %91 = vector.broadcast %c10_i32 : i32 to vector<8x16xi32>
    %92 = arith.cmpi eq, %20, %91 : vector<8x16xi32>
    %93 = vector.extract_strided_slice %23 {offsets = [10, 0], sizes = [1, 1], strides = [1, 1]} : vector<12x4xf32> to vector<1x1xf32>
    %94 = vector.shape_cast %93 : vector<1x1xf32> to vector<1x1xf32>
    %95 = vector.broadcast %94 : vector<1x1xf32> to vector<8x16xf32>
    %96 = arith.select %92, %95, %90 : vector<8x16xi1>, vector<8x16xf32>
    %c11_i32_24 = arith.constant 11 : i32
    %97 = vector.broadcast %c11_i32_24 : i32 to vector<8x16xi32>
    %98 = arith.cmpi eq, %20, %97 : vector<8x16xi32>
    %99 = vector.extract_strided_slice %23 {offsets = [11, 0], sizes = [1, 1], strides = [1, 1]} : vector<12x4xf32> to vector<1x1xf32>
    %100 = vector.shape_cast %99 : vector<1x1xf32> to vector<1x1xf32>
    %101 = vector.broadcast %100 : vector<1x1xf32> to vector<8x16xf32>
    %102 = arith.select %98, %101, %96 : vector<8x16xi1>, vector<8x16xf32>
    %103 = arith.addf %29, %102 : vector<8x16xf32>
    %104 = vector.broadcast %22 : vector<1x16xf32> to vector<8x16xf32>
    %105 = arith.addf %103, %104 : vector<8x16xf32>
    %cst_25 = arith.constant dense<0xFF800000> : vector<8xf32>
    %106 = vector.multi_reduction <maximumf>, %105, %cst_25 [1] : vector<8x16xf32> to vector<8xf32>
    %107 = vector.shape_cast %106 : vector<8xf32> to vector<8x1xf32>
    %108 = vector.broadcast %107 : vector<8x1xf32> to vector<8x16xf32>
    %109 = arith.subf %105, %108 : vector<8x16xf32>
    %110 = math.exp %109 : vector<8x16xf32>
    %cst_26 = arith.constant dense<0.000000e+00> : vector<8xf32>
    %111 = vector.multi_reduction <add>, %110, %cst_26 [1] : vector<8x16xf32> to vector<8xf32>
    %112 = vector.shape_cast %111 : vector<8xf32> to vector<8x1xf32>
    %cst_27 = arith.constant dense<0.000000e+00> : vector<8x8xf32>
    %113 = tpu.matmul %110, %26, %cst_27 {dimension_numbers = #tpu.dot_dimension_numbers<[1], [0], [0], [1], [0, 0, 1, 1], [], []>} : vector<8x16xf32>, vector<16x8xf32>, vector<8x8xf32> -> vector<8x8xf32>
    %114 = tpu.reciprocal %112 : vector<8x1xf32> -> vector<8x1xf32>
    %115 = vector.broadcast %114 : vector<8x1xf32> to vector<8x8xf32>
    %116 = arith.mulf %113, %115 : vector<8x8xf32>
    %c0_28 = arith.constant 0 : index
    %c0_29 = arith.constant 0 : index
    %117 = vector.load %arg26[%c0_28, %c0_29] : memref<8x32xf32, #tpu.memory_space<vmem>>, vector<8x8xf32>
    tpu.vector_store %arg26[%c0_28, %c0_29], %116 {strides = array<i32>} : memref<8x32xf32, #tpu.memory_space<vmem>>, vector<8x8xf32>,
    %118 = vector.extract_strided_slice %9 {offsets = [0, 8], sizes = [8, 8], strides = [1, 1]} : vector<8x32xf32> to vector<8x8xf32>
    %c0_30 = arith.constant 0 : index
    %c8 = arith.constant 8 : index
    %119 = vector.load %arg24[%c0_30, %c8] : memref<16x32xf32, #tpu.memory_space<vmem>>, vector<16x8xf32>
    %c0_31 = arith.constant 0 : index
    %c8_32 = arith.constant 8 : index
    %120 = vector.load %arg25[%c0_31, %c8_32] : memref<16x32xf32, #tpu.memory_space<vmem>>, vector<16x8xf32>
    %cst_33 = arith.constant dense<0.000000e+00> : vector<8x16xf32>
    %121 = tpu.matmul %118, %119, %cst_33 {dimension_numbers = #tpu.dot_dimension_numbers<[1], [1], [0], [0], [0, 0, 1, 0], [], []>} : vector<8x8xf32>, vector<16x8xf32>, vector<8x16xf32> -> vector<8x16xf32>
    %cst_34 = arith.constant 0.353553385 : f32
    %122 = vector.broadcast %cst_34 : f32 to vector<8x16xf32>
    %123 = arith.mulf %121, %122 : vector<8x16xf32>
    %cst_35 = arith.constant 0.000000e+00 : f32
    %124 = vector.broadcast %cst_35 : f32 to vector<8x16xf32>
    %c0_i32_36 = arith.constant 0 : i32
    %125 = vector.broadcast %c0_i32_36 : i32 to vector<8x16xi32>
    %126 = arith.cmpi eq, %20, %125 : vector<8x16xi32>
    %127 = vector.extract_strided_slice %23 {offsets = [0, 1], sizes = [1, 1], strides = [1, 1]} : vector<12x4xf32> to vector<1x1xf32>
    %128 = vector.shape_cast %127 : vector<1x1xf32> to vector<1x1xf32>
    %129 = vector.broadcast %128 : vector<1x1xf32> to vector<8x16xf32>
    %130 = arith.select %126, %129, %124 : vector<8x16xi1>, vector<8x16xf32>
    %c1_i32_37 = arith.constant 1 : i32
    %131 = vector.broadcast %c1_i32_37 : i32 to vector<8x16xi32>
    %132 = arith.cmpi eq, %20, %131 : vector<8x16xi32>
    %133 = vector.extract_strided_slice %23 {offsets = [1, 1], sizes = [1, 1], strides = [1, 1]} : vector<12x4xf32> to vector<1x1xf32>
    %134 = vector.shape_cast %133 : vector<1x1xf32> to vector<1x1xf32>
    %135 = vector.broadcast %134 : vector<1x1xf32> to vector<8x16xf32>
    %136 = arith.select %132, %135, %130 : vector<8x16xi1>, vector<8x16xf32>
    %c2_i32_38 = arith.constant 2 : i32
    %137 = vector.broadcast %c2_i32_38 : i32 to vector<8x16xi32>
    %138 = arith.cmpi eq, %20, %137 : vector<8x16xi32>
    %139 = vector.extract_strided_slice %23 {offsets = [2, 1], sizes = [1, 1], strides = [1, 1]} : vector<12x4xf32> to vector<1x1xf32>
    %140 = vector.shape_cast %139 : vector<1x1xf32> to vector<1x1xf32>
    %141 = vector.broadcast %140 : vector<1x1xf32> to vector<8x16xf32>
    %142 = arith.select %138, %141, %136 : vector<8x16xi1>, vector<8x16xf32>
    %c3_i32_39 = arith.constant 3 : i32
    %143 = vector.broadcast %c3_i32_39 : i32 to vector<8x16xi32>
    %144 = arith.cmpi eq, %20, %143 : vector<8x16xi32>
    %145 = vector.extract_strided_slice %23 {offsets = [3, 1], sizes = [1, 1], strides = [1, 1]} : vector<12x4xf32> to vector<1x1xf32>
    %146 = vector.shape_cast %145 : vector<1x1xf32> to vector<1x1xf32>
    %147 = vector.broadcast %146 : vector<1x1xf32> to vector<8x16xf32>
    %148 = arith.select %144, %147, %142 : vector<8x16xi1>, vector<8x16xf32>
    %c4_i32_40 = arith.constant 4 : i32
    %149 = vector.broadcast %c4_i32_40 : i32 to vector<8x16xi32>
    %150 = arith.cmpi eq, %20, %149 : vector<8x16xi32>
    %151 = vector.extract_strided_slice %23 {offsets = [4, 1], sizes = [1, 1], strides = [1, 1]} : vector<12x4xf32> to vector<1x1xf32>
    %152 = vector.shape_cast %151 : vector<1x1xf32> to vector<1x1xf32>
    %153 = vector.broadcast %152 : vector<1x1xf32> to vector<8x16xf32>
    %154 = arith.select %150, %153, %148 : vector<8x16xi1>, vector<8x16xf32>
    %c5_i32_41 = arith.constant 5 : i32
    %155 = vector.broadcast %c5_i32_41 : i32 to vector<8x16xi32>
    %156 = arith.cmpi eq, %20, %155 : vector<8x16xi32>
    %157 = vector.extract_strided_slice %23 {offsets = [5, 1], sizes = [1, 1], strides = [1, 1]} : vector<12x4xf32> to vector<1x1xf32>
    %158 = vector.shape_cast %157 : vector<1x1xf32> to vector<1x1xf32>
    %159 = vector.broadcast %158 : vector<1x1xf32> to vector<8x16xf32>
    %160 = arith.select %156, %159, %154 : vector<8x16xi1>, vector<8x16xf32>
    %c6_i32_42 = arith.constant 6 : i32
    %161 = vector.broadcast %c6_i32_42 : i32 to vector<8x16xi32>
    %162 = arith.cmpi eq, %20, %161 : vector<8x16xi32>
    %163 = vector.extract_strided_slice %23 {offsets = [6, 1], sizes = [1, 1], strides = [1, 1]} : vector<12x4xf32> to vector<1x1xf32>
    %164 = vector.shape_cast %163 : vector<1x1xf32> to vector<1x1xf32>
    %165 = vector.broadcast %164 : vector<1x1xf32> to vector<8x16xf32>
    %166 = arith.select %162, %165, %160 : vector<8x16xi1>, vector<8x16xf32>
    %c7_i32_43 = arith.constant 7 : i32
    %167 = vector.broadcast %c7_i32_43 : i32 to vector<8x16xi32>
    %168 = arith.cmpi eq, %20, %167 : vector<8x16xi32>
    %169 = vector.extract_strided_slice %23 {offsets = [7, 1], sizes = [1, 1], strides = [1, 1]} : vector<12x4xf32> to vector<1x1xf32>
    %170 = vector.shape_cast %169 : vector<1x1xf32> to vector<1x1xf32>
    %171 = vector.broadcast %170 : vector<1x1xf32> to vector<8x16xf32>
    %172 = arith.select %168, %171, %166 : vector<8x16xi1>, vector<8x16xf32>
    %c8_i32_44 = arith.constant 8 : i32
    %173 = vector.broadcast %c8_i32_44 : i32 to vector<8x16xi32>
    %174 = arith.cmpi eq, %20, %173 : vector<8x16xi32>
    %175 = vector.extract_strided_slice %23 {offsets = [8, 1], sizes = [1, 1], strides = [1, 1]} : vector<12x4xf32> to vector<1x1xf32>
    %176 = vector.shape_cast %175 : vector<1x1xf32> to vector<1x1xf32>
    %177 = vector.broadcast %176 : vector<1x1xf32> to vector<8x16xf32>
    %178 = arith.select %174, %177, %172 : vector<8x16xi1>, vector<8x16xf32>
    %c9_i32_45 = arith.constant 9 : i32
    %179 = vector.broadcast %c9_i32_45 : i32 to vector<8x16xi32>
    %180 = arith.cmpi eq, %20, %179 : vector<8x16xi32>
    %181 = vector.extract_strided_slice %23 {offsets = [9, 1], sizes = [1, 1], strides = [1, 1]} : vector<12x4xf32> to vector<1x1xf32>
    %182 = vector.shape_cast %181 : vector<1x1xf32> to vector<1x1xf32>
    %183 = vector.broadcast %182 : vector<1x1xf32> to vector<8x16xf32>
    %184 = arith.select %180, %183, %178 : vector<8x16xi1>, vector<8x16xf32>
    %c10_i32_46 = arith.constant 10 : i32
    %185 = vector.broadcast %c10_i32_46 : i32 to vector<8x16xi32>
    %186 = arith.cmpi eq, %20, %185 : vector<8x16xi32>
    %187 = vector.extract_strided_slice %23 {offsets = [10, 1], sizes = [1, 1], strides = [1, 1]} : vector<12x4xf32> to vector<1x1xf32>
    %188 = vector.shape_cast %187 : vector<1x1xf32> to vector<1x1xf32>
    %189 = vector.broadcast %188 : vector<1x1xf32> to vector<8x16xf32>
    %190 = arith.select %186, %189, %184 : vector<8x16xi1>, vector<8x16xf32>
    %c11_i32_47 = arith.constant 11 : i32
    %191 = vector.broadcast %c11_i32_47 : i32 to vector<8x16xi32>
    %192 = arith.cmpi eq, %20, %191 : vector<8x16xi32>
    %193 = vector.extract_strided_slice %23 {offsets = [11, 1], sizes = [1, 1], strides = [1, 1]} : vector<12x4xf32> to vector<1x1xf32>
    %194 = vector.shape_cast %193 : vector<1x1xf32> to vector<1x1xf32>
    %195 = vector.broadcast %194 : vector<1x1xf32> to vector<8x16xf32>
    %196 = arith.select %192, %195, %190 : vector<8x16xi1>, vector<8x16xf32>
    %197 = arith.addf %123, %196 : vector<8x16xf32>
    %198 = vector.broadcast %22 : vector<1x16xf32> to vector<8x16xf32>
    %199 = arith.addf %197, %198 : vector<8x16xf32>
    %cst_48 = arith.constant dense<0xFF800000> : vector<8xf32>
    %200 = vector.multi_reduction <maximumf>, %199, %cst_48 [1] : vector<8x16xf32> to vector<8xf32>
    %201 = vector.shape_cast %200 : vector<8xf32> to vector<8x1xf32>
    %202 = vector.broadcast %201 : vector<8x1xf32> to vector<8x16xf32>
    %203 = arith.subf %199, %202 : vector<8x16xf32>
    %204 = math.exp %203 : vector<8x16xf32>
    %cst_49 = arith.constant dense<0.000000e+00> : vector<8xf32>
    %205 = vector.multi_reduction <add>, %204, %cst_49 [1] : vector<8x16xf32> to vector<8xf32>
    %206 = vector.shape_cast %205 : vector<8xf32> to vector<8x1xf32>
    %cst_50 = arith.constant dense<0.000000e+00> : vector<8x8xf32>
    %207 = tpu.matmul %204, %120, %cst_50 {dimension_numbers = #tpu.dot_dimension_numbers<[1], [0], [0], [1], [0, 0, 1, 1], [], []>} : vector<8x16xf32>, vector<16x8xf32>, vector<8x8xf32> -> vector<8x8xf32>
    %208 = tpu.reciprocal %206 : vector<8x1xf32> -> vector<8x1xf32>
    %209 = vector.broadcast %208 : vector<8x1xf32> to vector<8x8xf32>
    %210 = arith.mulf %207, %209 : vector<8x8xf32>
    %c0_51 = arith.constant 0 : index
    %c8_52 = arith.constant 8 : index
    %211 = vector.load %arg26[%c0_51, %c8_52] : memref<8x32xf32, #tpu.memory_space<vmem>>, vector<8x8xf32>
    tpu.vector_store %arg26[%c0_51, %c8_52], %210 {strides = array<i32>} : memref<8x32xf32, #tpu.memory_space<vmem>>, vector<8x8xf32>,
    %212 = vector.extract_strided_slice %9 {offsets = [0, 16], sizes = [8, 8], strides = [1, 1]} : vector<8x32xf32> to vector<8x8xf32>
    %c0_53 = arith.constant 0 : index
    %c16 = arith.constant 16 : index
    %213 = vector.load %arg24[%c0_53, %c16] : memref<16x32xf32, #tpu.memory_space<vmem>>, vector<16x8xf32>
    %c0_54 = arith.constant 0 : index
    %c16_55 = arith.constant 16 : index
    %214 = vector.load %arg25[%c0_54, %c16_55] : memref<16x32xf32, #tpu.memory_space<vmem>>, vector<16x8xf32>
    %cst_56 = arith.constant dense<0.000000e+00> : vector<8x16xf32>
    %215 = tpu.matmul %212, %213, %cst_56 {dimension_numbers = #tpu.dot_dimension_numbers<[1], [1], [0], [0], [0, 0, 1, 0], [], []>} : vector<8x8xf32>, vector<16x8xf32>, vector<8x16xf32> -> vector<8x16xf32>
    %cst_57 = arith.constant 0.353553385 : f32
    %216 = vector.broadcast %cst_57 : f32 to vector<8x16xf32>
    %217 = arith.mulf %215, %216 : vector<8x16xf32>
    %cst_58 = arith.constant 0.000000e+00 : f32
    %218 = vector.broadcast %cst_58 : f32 to vector<8x16xf32>
    %c0_i32_59 = arith.constant 0 : i32
    %219 = vector.broadcast %c0_i32_59 : i32 to vector<8x16xi32>
    %220 = arith.cmpi eq, %20, %219 : vector<8x16xi32>
    %221 = vector.extract_strided_slice %23 {offsets = [0, 2], sizes = [1, 1], strides = [1, 1]} : vector<12x4xf32> to vector<1x1xf32>
    %222 = vector.shape_cast %221 : vector<1x1xf32> to vector<1x1xf32>
    %223 = vector.broadcast %222 : vector<1x1xf32> to vector<8x16xf32>
    %224 = arith.select %220, %223, %218 : vector<8x16xi1>, vector<8x16xf32>
    %c1_i32_60 = arith.constant 1 : i32
    %225 = vector.broadcast %c1_i32_60 : i32 to vector<8x16xi32>
    %226 = arith.cmpi eq, %20, %225 : vector<8x16xi32>
    %227 = vector.extract_strided_slice %23 {offsets = [1, 2], sizes = [1, 1], strides = [1, 1]} : vector<12x4xf32> to vector<1x1xf32>
    %228 = vector.shape_cast %227 : vector<1x1xf32> to vector<1x1xf32>
    %229 = vector.broadcast %228 : vector<1x1xf32> to vector<8x16xf32>
    %230 = arith.select %226, %229, %224 : vector<8x16xi1>, vector<8x16xf32>
    %c2_i32_61 = arith.constant 2 : i32
    %231 = vector.broadcast %c2_i32_61 : i32 to vector<8x16xi32>
    %232 = arith.cmpi eq, %20, %231 : vector<8x16xi32>
    %233 = vector.extract_strided_slice %23 {offsets = [2, 2], sizes = [1, 1], strides = [1, 1]} : vector<12x4xf32> to vector<1x1xf32>
    %234 = vector.shape_cast %233 : vector<1x1xf32> to vector<1x1xf32>
    %235 = vector.broadcast %234 : vector<1x1xf32> to vector<8x16xf32>
    %236 = arith.select %232, %235, %230 : vector<8x16xi1>, vector<8x16xf32>
    %c3_i32_62 = arith.constant 3 : i32
    %237 = vector.broadcast %c3_i32_62 : i32 to vector<8x16xi32>
    %238 = arith.cmpi eq, %20, %237 : vector<8x16xi32>
    %239 = vector.extract_strided_slice %23 {offsets = [3, 2], sizes = [1, 1], strides = [1, 1]} : vector<12x4xf32> to vector<1x1xf32>
    %240 = vector.shape_cast %239 : vector<1x1xf32> to vector<1x1xf32>
    %241 = vector.broadcast %240 : vector<1x1xf32> to vector<8x16xf32>
    %242 = arith.select %238, %241, %236 : vector<8x16xi1>, vector<8x16xf32>
    %c4_i32_63 = arith.constant 4 : i32
    %243 = vector.broadcast %c4_i32_63 : i32 to vector<8x16xi32>
    %244 = arith.cmpi eq, %20, %243 : vector<8x16xi32>
    %245 = vector.extract_strided_slice %23 {offsets = [4, 2], sizes = [1, 1], strides = [1, 1]} : vector<12x4xf32> to vector<1x1xf32>
    %246 = vector.shape_cast %245 : vector<1x1xf32> to vector<1x1xf32>
    %247 = vector.broadcast %246 : vector<1x1xf32> to vector<8x16xf32>
    %248 = arith.select %244, %247, %242 : vector<8x16xi1>, vector<8x16xf32>
    %c5_i32_64 = arith.constant 5 : i32
    %249 = vector.broadcast %c5_i32_64 : i32 to vector<8x16xi32>
    %250 = arith.cmpi eq, %20, %249 : vector<8x16xi32>
    %251 = vector.extract_strided_slice %23 {offsets = [5, 2], sizes = [1, 1], strides = [1, 1]} : vector<12x4xf32> to vector<1x1xf32>
    %252 = vector.shape_cast %251 : vector<1x1xf32> to vector<1x1xf32>
    %253 = vector.broadcast %252 : vector<1x1xf32> to vector<8x16xf32>
    %254 = arith.select %250, %253, %248 : vector<8x16xi1>, vector<8x16xf32>
    %c6_i32_65 = arith.constant 6 : i32
    %255 = vector.broadcast %c6_i32_65 : i32 to vector<8x16xi32>
    %256 = arith.cmpi eq, %20, %255 : vector<8x16xi32>
    %257 = vector.extract_strided_slice %23 {offsets = [6, 2], sizes = [1, 1], strides = [1, 1]} : vector<12x4xf32> to vector<1x1xf32>
    %258 = vector.shape_cast %257 : vector<1x1xf32> to vector<1x1xf32>
    %259 = vector.broadcast %258 : vector<1x1xf32> to vector<8x16xf32>
    %260 = arith.select %256, %259, %254 : vector<8x16xi1>, vector<8x16xf32>
    %c7_i32_66 = arith.constant 7 : i32
    %261 = vector.broadcast %c7_i32_66 : i32 to vector<8x16xi32>
    %262 = arith.cmpi eq, %20, %261 : vector<8x16xi32>
    %263 = vector.extract_strided_slice %23 {offsets = [7, 2], sizes = [1, 1], strides = [1, 1]} : vector<12x4xf32> to vector<1x1xf32>
    %264 = vector.shape_cast %263 : vector<1x1xf32> to vector<1x1xf32>
    %265 = vector.broadcast %264 : vector<1x1xf32> to vector<8x16xf32>
    %266 = arith.select %262, %265, %260 : vector<8x16xi1>, vector<8x16xf32>
    %c8_i32_67 = arith.constant 8 : i32
    %267 = vector.broadcast %c8_i32_67 : i32 to vector<8x16xi32>
    %268 = arith.cmpi eq, %20, %267 : vector<8x16xi32>
    %269 = vector.extract_strided_slice %23 {offsets = [8, 2], sizes = [1, 1], strides = [1, 1]} : vector<12x4xf32> to vector<1x1xf32>
    %270 = vector.shape_cast %269 : vector<1x1xf32> to vector<1x1xf32>
    %271 = vector.broadcast %270 : vector<1x1xf32> to vector<8x16xf32>
    %272 = arith.select %268, %271, %266 : vector<8x16xi1>, vector<8x16xf32>
    %c9_i32_68 = arith.constant 9 : i32
    %273 = vector.broadcast %c9_i32_68 : i32 to vector<8x16xi32>
    %274 = arith.cmpi eq, %20, %273 : vector<8x16xi32>
    %275 = vector.extract_strided_slice %23 {offsets = [9, 2], sizes = [1, 1], strides = [1, 1]} : vector<12x4xf32> to vector<1x1xf32>
    %276 = vector.shape_cast %275 : vector<1x1xf32> to vector<1x1xf32>
    %277 = vector.broadcast %276 : vector<1x1xf32> to vector<8x16xf32>
    %278 = arith.select %274, %277, %272 : vector<8x16xi1>, vector<8x16xf32>
    %c10_i32_69 = arith.constant 10 : i32
    %279 = vector.broadcast %c10_i32_69 : i32 to vector<8x16xi32>
    %280 = arith.cmpi eq, %20, %279 : vector<8x16xi32>
    %281 = vector.extract_strided_slice %23 {offsets = [10, 2], sizes = [1, 1], strides = [1, 1]} : vector<12x4xf32> to vector<1x1xf32>
    %282 = vector.shape_cast %281 : vector<1x1xf32> to vector<1x1xf32>
    %283 = vector.broadcast %282 : vector<1x1xf32> to vector<8x16xf32>
    %284 = arith.select %280, %283, %278 : vector<8x16xi1>, vector<8x16xf32>
    %c11_i32_70 = arith.constant 11 : i32
    %285 = vector.broadcast %c11_i32_70 : i32 to vector<8x16xi32>
    %286 = arith.cmpi eq, %20, %285 : vector<8x16xi32>
    %287 = vector.extract_strided_slice %23 {offsets = [11, 2], sizes = [1, 1], strides = [1, 1]} : vector<12x4xf32> to vector<1x1xf32>
    %288 = vector.shape_cast %287 : vector<1x1xf32> to vector<1x1xf32>
    %289 = vector.broadcast %288 : vector<1x1xf32> to vector<8x16xf32>
    %290 = arith.select %286, %289, %284 : vector<8x16xi1>, vector<8x16xf32>
    %291 = arith.addf %217, %290 : vector<8x16xf32>
    %292 = vector.broadcast %22 : vector<1x16xf32> to vector<8x16xf32>
    %293 = arith.addf %291, %292 : vector<8x16xf32>
    %cst_71 = arith.constant dense<0xFF800000> : vector<8xf32>
    %294 = vector.multi_reduction <maximumf>, %293, %cst_71 [1] : vector<8x16xf32> to vector<8xf32>
    %295 = vector.shape_cast %294 : vector<8xf32> to vector<8x1xf32>
    %296 = vector.broadcast %295 : vector<8x1xf32> to vector<8x16xf32>
    %297 = arith.subf %293, %296 : vector<8x16xf32>
    %298 = math.exp %297 : vector<8x16xf32>
    %cst_72 = arith.constant dense<0.000000e+00> : vector<8xf32>
    %299 = vector.multi_reduction <add>, %298, %cst_72 [1] : vector<8x16xf32> to vector<8xf32>
    %300 = vector.shape_cast %299 : vector<8xf32> to vector<8x1xf32>
    %cst_73 = arith.constant dense<0.000000e+00> : vector<8x8xf32>
    %301 = tpu.matmul %298, %214, %cst_73 {dimension_numbers = #tpu.dot_dimension_numbers<[1], [0], [0], [1], [0, 0, 1, 1], [], []>} : vector<8x16xf32>, vector<16x8xf32>, vector<8x8xf32> -> vector<8x8xf32>
    %302 = tpu.reciprocal %300 : vector<8x1xf32> -> vector<8x1xf32>
    %303 = vector.broadcast %302 : vector<8x1xf32> to vector<8x8xf32>
    %304 = arith.mulf %301, %303 : vector<8x8xf32>
    %c0_74 = arith.constant 0 : index
    %c16_75 = arith.constant 16 : index
    %305 = vector.load %arg26[%c0_74, %c16_75] : memref<8x32xf32, #tpu.memory_space<vmem>>, vector<8x8xf32>
    tpu.vector_store %arg26[%c0_74, %c16_75], %304 {strides = array<i32>} : memref<8x32xf32, #tpu.memory_space<vmem>>, vector<8x8xf32>,
    %306 = vector.extract_strided_slice %9 {offsets = [0, 24], sizes = [8, 8], strides = [1, 1]} : vector<8x32xf32> to vector<8x8xf32>
    %c0_76 = arith.constant 0 : index
    %c24 = arith.constant 24 : index
    %307 = vector.load %arg24[%c0_76, %c24] : memref<16x32xf32, #tpu.memory_space<vmem>>, vector<16x8xf32>
    %c0_77 = arith.constant 0 : index
    %c24_78 = arith.constant 24 : index
    %308 = vector.load %arg25[%c0_77, %c24_78] : memref<16x32xf32, #tpu.memory_space<vmem>>, vector<16x8xf32>
    %cst_79 = arith.constant dense<0.000000e+00> : vector<8x16xf32>
    %309 = tpu.matmul %306, %307, %cst_79 {dimension_numbers = #tpu.dot_dimension_numbers<[1], [1], [0], [0], [0, 0, 1, 0], [], []>} : vector<8x8xf32>, vector<16x8xf32>, vector<8x16xf32> -> vector<8x16xf32>
    %cst_80 = arith.constant 0.353553385 : f32
    %310 = vector.broadcast %cst_80 : f32 to vector<8x16xf32>
    %311 = arith.mulf %309, %310 : vector<8x16xf32>
    %cst_81 = arith.constant 0.000000e+00 : f32
    %312 = vector.broadcast %cst_81 : f32 to vector<8x16xf32>
    %c0_i32_82 = arith.constant 0 : i32
    %313 = vector.broadcast %c0_i32_82 : i32 to vector<8x16xi32>
    %314 = arith.cmpi eq, %20, %313 : vector<8x16xi32>
    %315 = vector.extract_strided_slice %23 {offsets = [0, 3], sizes = [1, 1], strides = [1, 1]} : vector<12x4xf32> to vector<1x1xf32>
    %316 = vector.shape_cast %315 : vector<1x1xf32> to vector<1x1xf32>
    %317 = vector.broadcast %316 : vector<1x1xf32> to vector<8x16xf32>
    %318 = arith.select %314, %317, %312 : vector<8x16xi1>, vector<8x16xf32>
    %c1_i32_83 = arith.constant 1 : i32
    %319 = vector.broadcast %c1_i32_83 : i32 to vector<8x16xi32>
    %320 = arith.cmpi eq, %20, %319 : vector<8x16xi32>
    %321 = vector.extract_strided_slice %23 {offsets = [1, 3], sizes = [1, 1], strides = [1, 1]} : vector<12x4xf32> to vector<1x1xf32>
    %322 = vector.shape_cast %321 : vector<1x1xf32> to vector<1x1xf32>
    %323 = vector.broadcast %322 : vector<1x1xf32> to vector<8x16xf32>
    %324 = arith.select %320, %323, %318 : vector<8x16xi1>, vector<8x16xf32>
    %c2_i32_84 = arith.constant 2 : i32
    %325 = vector.broadcast %c2_i32_84 : i32 to vector<8x16xi32>
    %326 = arith.cmpi eq, %20, %325 : vector<8x16xi32>
    %327 = vector.extract_strided_slice %23 {offsets = [2, 3], sizes = [1, 1], strides = [1, 1]} : vector<12x4xf32> to vector<1x1xf32>
    %328 = vector.shape_cast %327 : vector<1x1xf32> to vector<1x1xf32>
    %329 = vector.broadcast %328 : vector<1x1xf32> to vector<8x16xf32>
    %330 = arith.select %326, %329, %324 : vector<8x16xi1>, vector<8x16xf32>
    %c3_i32_85 = arith.constant 3 : i32
    %331 = vector.broadcast %c3_i32_85 : i32 to vector<8x16xi32>
    %332 = arith.cmpi eq, %20, %331 : vector<8x16xi32>
    %333 = vector.extract_strided_slice %23 {offsets = [3, 3], sizes = [1, 1], strides = [1, 1]} : vector<12x4xf32> to vector<1x1xf32>
    %334 = vector.shape_cast %333 : vector<1x1xf32> to vector<1x1xf32>
    %335 = vector.broadcast %334 : vector<1x1xf32> to vector<8x16xf32>
    %336 = arith.select %332, %335, %330 : vector<8x16xi1>, vector<8x16xf32>
    %c4_i32_86 = arith.constant 4 : i32
    %337 = vector.broadcast %c4_i32_86 : i32 to vector<8x16xi32>
    %338 = arith.cmpi eq, %20, %337 : vector<8x16xi32>
    %339 = vector.extract_strided_slice %23 {offsets = [4, 3], sizes = [1, 1], strides = [1, 1]} : vector<12x4xf32> to vector<1x1xf32>
    %340 = vector.shape_cast %339 : vector<1x1xf32> to vector<1x1xf32>
    %341 = vector.broadcast %340 : vector<1x1xf32> to vector<8x16xf32>
    %342 = arith.select %338, %341, %336 : vector<8x16xi1>, vector<8x16xf32>
    %c5_i32_87 = arith.constant 5 : i32
    %343 = vector.broadcast %c5_i32_87 : i32 to vector<8x16xi32>
    %344 = arith.cmpi eq, %20, %343 : vector<8x16xi32>
    %345 = vector.extract_strided_slice %23 {offsets = [5, 3], sizes = [1, 1], strides = [1, 1]} : vector<12x4xf32> to vector<1x1xf32>
    %346 = vector.shape_cast %345 : vector<1x1xf32> to vector<1x1xf32>
    %347 = vector.broadcast %346 : vector<1x1xf32> to vector<8x16xf32>
    %348 = arith.select %344, %347, %342 : vector<8x16xi1>, vector<8x16xf32>
    %c6_i32_88 = arith.constant 6 : i32
    %349 = vector.broadcast %c6_i32_88 : i32 to vector<8x16xi32>
    %350 = arith.cmpi eq, %20, %349 : vector<8x16xi32>
    %351 = vector.extract_strided_slice %23 {offsets = [6, 3], sizes = [1, 1], strides = [1, 1]} : vector<12x4xf32> to vector<1x1xf32>
    %352 = vector.shape_cast %351 : vector<1x1xf32> to vector<1x1xf32>
    %353 = vector.broadcast %352 : vector<1x1xf32> to vector<8x16xf32>
    %354 = arith.select %350, %353, %348 : vector<8x16xi1>, vector<8x16xf32>
    %c7_i32_89 = arith.constant 7 : i32
    %355 = vector.broadcast %c7_i32_89 : i32 to vector<8x16xi32>
    %356 = arith.cmpi eq, %20, %355 : vector<8x16xi32>
    %357 = vector.extract_strided_slice %23 {offsets = [7, 3], sizes = [1, 1], strides = [1, 1]} : vector<12x4xf32> to vector<1x1xf32>
    %358 = vector.shape_cast %357 : vector<1x1xf32> to vector<1x1xf32>
    %359 = vector.broadcast %358 : vector<1x1xf32> to vector<8x16xf32>
    %360 = arith.select %356, %359, %354 : vector<8x16xi1>, vector<8x16xf32>
    %c8_i32_90 = arith.constant 8 : i32
    %361 = vector.broadcast %c8_i32_90 : i32 to vector<8x16xi32>
    %362 = arith.cmpi eq, %20, %361 : vector<8x16xi32>
    %363 = vector.extract_strided_slice %23 {offsets = [8, 3], sizes = [1, 1], strides = [1, 1]} : vector<12x4xf32> to vector<1x1xf32>
    %364 = vector.shape_cast %363 : vector<1x1xf32> to vector<1x1xf32>
    %365 = vector.broadcast %364 : vector<1x1xf32> to vector<8x16xf32>
    %366 = arith.select %362, %365, %360 : vector<8x16xi1>, vector<8x16xf32>
    %c9_i32_91 = arith.constant 9 : i32
    %367 = vector.broadcast %c9_i32_91 : i32 to vector<8x16xi32>
    %368 = arith.cmpi eq, %20, %367 : vector<8x16xi32>
    %369 = vector.extract_strided_slice %23 {offsets = [9, 3], sizes = [1, 1], strides = [1, 1]} : vector<12x4xf32> to vector<1x1xf32>
    %370 = vector.shape_cast %369 : vector<1x1xf32> to vector<1x1xf32>
    %371 = vector.broadcast %370 : vector<1x1xf32> to vector<8x16xf32>
    %372 = arith.select %368, %371, %366 : vector<8x16xi1>, vector<8x16xf32>
    %c10_i32_92 = arith.constant 10 : i32
    %373 = vector.broadcast %c10_i32_92 : i32 to vector<8x16xi32>
    %374 = arith.cmpi eq, %20, %373 : vector<8x16xi32>
    %375 = vector.extract_strided_slice %23 {offsets = [10, 3], sizes = [1, 1], strides = [1, 1]} : vector<12x4xf32> to vector<1x1xf32>
    %376 = vector.shape_cast %375 : vector<1x1xf32> to vector<1x1xf32>
    %377 = vector.broadcast %376 : vector<1x1xf32> to vector<8x16xf32>
    %378 = arith.select %374, %377, %372 : vector<8x16xi1>, vector<8x16xf32>
    %c11_i32_93 = arith.constant 11 : i32
    %379 = vector.broadcast %c11_i32_93 : i32 to vector<8x16xi32>
    %380 = arith.cmpi eq, %20, %379 : vector<8x16xi32>
    %381 = vector.extract_strided_slice %23 {offsets = [11, 3], sizes = [1, 1], strides = [1, 1]} : vector<12x4xf32> to vector<1x1xf32>
    %382 = vector.shape_cast %381 : vector<1x1xf32> to vector<1x1xf32>
    %383 = vector.broadcast %382 : vector<1x1xf32> to vector<8x16xf32>
    %384 = arith.select %380, %383, %378 : vector<8x16xi1>, vector<8x16xf32>
    %385 = arith.addf %311, %384 : vector<8x16xf32>
    %386 = vector.broadcast %22 : vector<1x16xf32> to vector<8x16xf32>
    %387 = arith.addf %385, %386 : vector<8x16xf32>
    %cst_94 = arith.constant dense<0xFF800000> : vector<8xf32>
    %388 = vector.multi_reduction <maximumf>, %387, %cst_94 [1] : vector<8x16xf32> to vector<8xf32>
    %389 = vector.shape_cast %388 : vector<8xf32> to vector<8x1xf32>
    %390 = vector.broadcast %389 : vector<8x1xf32> to vector<8x16xf32>
    %391 = arith.subf %387, %390 : vector<8x16xf32>
    %392 = math.exp %391 : vector<8x16xf32>
    %cst_95 = arith.constant dense<0.000000e+00> : vector<8xf32>
    %393 = vector.multi_reduction <add>, %392, %cst_95 [1] : vector<8x16xf32> to vector<8xf32>
    %394 = vector.shape_cast %393 : vector<8xf32> to vector<8x1xf32>
    %cst_96 = arith.constant dense<0.000000e+00> : vector<8x8xf32>
    %395 = tpu.matmul %392, %308, %cst_96 {dimension_numbers = #tpu.dot_dimension_numbers<[1], [0], [0], [1], [0, 0, 1, 1], [], []>} : vector<8x16xf32>, vector<16x8xf32>, vector<8x8xf32> -> vector<8x8xf32>
    %396 = tpu.reciprocal %394 : vector<8x1xf32> -> vector<8x1xf32>
    %397 = vector.broadcast %396 : vector<8x1xf32> to vector<8x8xf32>
    %398 = arith.mulf %395, %397 : vector<8x8xf32>
    %c0_97 = arith.constant 0 : index
    %c24_98 = arith.constant 24 : index
    %399 = vector.load %arg26[%c0_97, %c24_98] : memref<8x32xf32, #tpu.memory_space<vmem>>, vector<8x8xf32>
    tpu.vector_store %arg26[%c0_97, %c24_98], %398 {strides = array<i32>} : memref<8x32xf32, #tpu.memory_space<vmem>>, vector<8x8xf32>,
    %c0_99 = arith.constant 0 : index
    %c0_100 = arith.constant 0 : index
    %400 = vector.load %arg26[%c0_99, %c0_100] : memref<8x32xf32, #tpu.memory_space<vmem>>, vector<8x32xf32>
    %c0_101 = arith.constant 0 : index
    %c0_102 = arith.constant 0 : index
    %401 = vector.load %arg13[%c0_101, %c0_102] : memref<32x32xf32, #tpu.memory_space<vmem>>, vector<32x32xf32>
    %cst_103 = arith.constant dense<0.000000e+00> : vector<8x32xf32>
    %402 = tpu.matmul %400, %401, %cst_103 {dimension_numbers = #tpu.dot_dimension_numbers<[1], [0], [0], [1], [0, 0, 1, 1], [], []>} : vector<8x32xf32>, vector<32x32xf32>, vector<8x32xf32> -> vector<8x32xf32>
    %c0_104 = arith.constant 0 : index
    %c0_105 = arith.constant 0 : index
    %403 = vector.load %arg14[%c0_104, %c0_105] : memref<1x32xf32, #tpu.memory_space<vmem>>, vector<1x32xf32>
    %404 = vector.broadcast %403 : vector<1x32xf32> to vector<8x32xf32>
    %405 = arith.addf %402, %404 : vector<8x32xf32>
    %406 = arith.addf %4, %405 : vector<8x32xf32>
    %cst_106 = arith.constant dense<0.000000e+00> : vector<8xf32>
    %407 = vector.multi_reduction <add>, %406, %cst_106 [1] : vector<8x32xf32> to vector<8xf32>
    %408 = vector.shape_cast %407 : vector<8xf32> to vector<8x1xf32>
    %cst_107 = arith.constant 3.200000e+01 : f32
    %409 = vector.broadcast %cst_107 : f32 to vector<8x1xf32>
    %410 = arith.divf %408, %409 : vector<8x1xf32>
    %411 = vector.broadcast %410 : vector<8x1xf32> to vector<8x32xf32>
    %412 = arith.subf %406, %411 : vector<8x32xf32>
    %413 = arith.mulf %412, %412 : vector<8x32xf32>
    %cst_108 = arith.constant dense<0.000000e+00> : vector<8xf32>
    %414 = vector.multi_reduction <add>, %413, %cst_108 [1] : vector<8x32xf32> to vector<8xf32>
    %415 = vector.shape_cast %414 : vector<8xf32> to vector<8x1xf32>
    %cst_109 = arith.constant 3.200000e+01 : f32
    %416 = vector.broadcast %cst_109 : f32 to vector<8x1xf32>
    %417 = arith.divf %415, %416 : vector<8x1xf32>
    %418 = vector.broadcast %410 : vector<8x1xf32> to vector<8x32xf32>
    %419 = arith.subf %406, %418 : vector<8x32xf32>
    %cst_110 = arith.constant 9.99999997E-7 : f32
    %420 = vector.broadcast %cst_110 : f32 to vector<8x1xf32>
    %421 = arith.addf %417, %420 : vector<8x1xf32>
    %422 = math.rsqrt %421 : vector<8x1xf32>
    %423 = vector.broadcast %422 : vector<8x1xf32> to vector<8x32xf32>
    %424 = arith.mulf %419, %423 : vector<8x32xf32>
    %c0_111 = arith.constant 0 : index
    %c0_112 = arith.constant 0 : index
    %425 = vector.load %arg15[%c0_111, %c0_112] : memref<1x32xf32, #tpu.memory_space<vmem>>, vector<1x32xf32>
    %426 = vector.broadcast %425 : vector<1x32xf32> to vector<8x32xf32>
    %427 = arith.mulf %424, %426 : vector<8x32xf32>
    %c0_113 = arith.constant 0 : index
    %c0_114 = arith.constant 0 : index
    %428 = vector.load %arg16[%c0_113, %c0_114] : memref<1x32xf32, #tpu.memory_space<vmem>>, vector<1x32xf32>
    %429 = vector.broadcast %428 : vector<1x32xf32> to vector<8x32xf32>
    %430 = arith.addf %427, %429 : vector<8x32xf32>
    %c0_115 = arith.constant 0 : index
    %c0_116 = arith.constant 0 : index
    %431 = vector.load %arg17[%c0_115, %c0_116] : memref<32x64xf32, #tpu.memory_space<vmem>>, vector<32x64xf32>
    %cst_117 = arith.constant dense<0.000000e+00> : vector<8x64xf32>
    %432 = tpu.matmul %430, %431, %cst_117 {dimension_numbers = #tpu.dot_dimension_numbers<[1], [0], [0], [1], [0, 0, 1, 1], [], []>} : vector<8x32xf32>, vector<32x64xf32>, vector<8x64xf32> -> vector<8x64xf32>
    %c0_118 = arith.constant 0 : index
    %c0_119 = arith.constant 0 : index
    %433 = vector.load %arg18[%c0_118, %c0_119] : memref<1x64xf32, #tpu.memory_space<vmem>>, vector<1x64xf32>
    %434 = vector.broadcast %433 : vector<1x64xf32> to vector<8x64xf32>
    %435 = arith.addf %432, %434 : vector<8x64xf32>
    %cst_120 = arith.constant 5.000000e-01 : f32
    %436 = vector.broadcast %cst_120 : f32 to vector<8x64xf32>
    %437 = arith.mulf %436, %435 : vector<8x64xf32>
    %cst_121 = arith.constant 0.707106769 : f32
    %438 = vector.broadcast %cst_121 : f32 to vector<8x64xf32>
    %439 = arith.mulf %435, %438 : vector<8x64xf32>
    %440 = math.absf %439 : vector<8x64xf32>
    %cst_122 = arith.constant 0.327591091 : f32
    %441 = vector.broadcast %cst_122 : f32 to vector<8x64xf32>
    %442 = arith.mulf %441, %440 : vector<8x64xf32>
    %cst_123 = arith.constant 1.000000e+00 : f32
    %443 = vector.broadcast %cst_123 : f32 to vector<8x64xf32>
    %444 = arith.addf %443, %442 : vector<8x64xf32>
    %cst_124 = arith.constant 1.000000e+00 : f32
    %445 = vector.broadcast %cst_124 : f32 to vector<8x64xf32>
    %446 = arith.divf %445, %444 : vector<8x64xf32>
    %cst_125 = arith.constant 1.06140542 : f32
    %447 = vector.broadcast %cst_125 : f32 to vector<8x64xf32>
    %448 = arith.mulf %447, %446 : vector<8x64xf32>
    %cst_126 = arith.constant -1.45315206 : f32
    %449 = vector.broadcast %cst_126 : f32 to vector<8x64xf32>
    %450 = arith.addf %448, %449 : vector<8x64xf32>
    %451 = arith.mulf %450, %446 : vector<8x64xf32>
    %cst_127 = arith.constant 1.42141378 : f32
    %452 = vector.broadcast %cst_127 : f32 to vector<8x64xf32>
    %453 = arith.addf %451, %452 : vector<8x64xf32>
    %454 = arith.mulf %453, %446 : vector<8x64xf32>
    %cst_128 = arith.constant -0.284496725 : f32
    %455 = vector.broadcast %cst_128 : f32 to vector<8x64xf32>
    %456 = arith.addf %454, %455 : vector<8x64xf32>
    %457 = arith.mulf %456, %446 : vector<8x64xf32>
    %cst_129 = arith.constant 0.254829586 : f32
    %458 = vector.broadcast %cst_129 : f32 to vector<8x64xf32>
    %459 = arith.addf %457, %458 : vector<8x64xf32>
    %460 = arith.mulf %459, %446 : vector<8x64xf32>
    %cst_130 = arith.constant 0.000000e+00 : f32
    %461 = vector.broadcast %cst_130 : f32 to vector<8x64xf32>
    %462 = arith.subf %461, %440 : vector<8x64xf32>
    %463 = arith.mulf %462, %440 : vector<8x64xf32>
    %464 = math.exp %463 : vector<8x64xf32>
    %465 = arith.mulf %460, %464 : vector<8x64xf32>
    %cst_131 = arith.constant 1.000000e+00 : f32
    %466 = vector.broadcast %cst_131 : f32 to vector<8x64xf32>
    %467 = arith.subf %466, %465 : vector<8x64xf32>
    %cst_132 = arith.constant 0.000000e+00 : f32
    %468 = vector.broadcast %cst_132 : f32 to vector<8x64xf32>
    %469 = arith.cmpf olt, %439, %468 : vector<8x64xf32>
    %cst_133 = arith.constant 0.000000e+00 : f32
    %470 = vector.broadcast %cst_133 : f32 to vector<8x64xf32>
    %471 = arith.subf %470, %467 : vector<8x64xf32>
    %472 = arith.select %469, %471, %467 : vector<8x64xi1>, vector<8x64xf32>
    %cst_134 = arith.constant 1.000000e+00 : f32
    %473 = vector.broadcast %cst_134 : f32 to vector<8x64xf32>
    %474 = arith.addf %473, %472 : vector<8x64xf32>
    %475 = arith.mulf %437, %474 : vector<8x64xf32>
    %c0_135 = arith.constant 0 : index
    %c0_136 = arith.constant 0 : index
    %476 = vector.load %arg19[%c0_135, %c0_136] : memref<64x32xf32, #tpu.memory_space<vmem>>, vector<64x32xf32>
    %cst_137 = arith.constant dense<0.000000e+00> : vector<8x32xf32>
    %477 = tpu.matmul %475, %476, %cst_137 {dimension_numbers = #tpu.dot_dimension_numbers<[1], [0], [0], [1], [0, 0, 1, 1], [], []>} : vector<8x64xf32>, vector<64x32xf32>, vector<8x32xf32> -> vector<8x32xf32>
    %c0_138 = arith.constant 0 : index
    %c0_139 = arith.constant 0 : index
    %478 = vector.load %arg20[%c0_138, %c0_139] : memref<1x32xf32, #tpu.memory_space<vmem>>, vector<1x32xf32>
    %479 = vector.broadcast %478 : vector<1x32xf32> to vector<8x32xf32>
    %480 = arith.addf %477, %479 : vector<8x32xf32>
    %481 = arith.addf %430, %480 : vector<8x32xf32>
    %cst_140 = arith.constant dense<0.000000e+00> : vector<8xf32>
    %482 = vector.multi_reduction <add>, %481, %cst_140 [1] : vector<8x32xf32> to vector<8xf32>
    %483 = vector.shape_cast %482 : vector<8xf32> to vector<8x1xf32>
    %cst_141 = arith.constant 3.200000e+01 : f32
    %484 = vector.broadcast %cst_141 : f32 to vector<8x1xf32>
    %485 = arith.divf %483, %484 : vector<8x1xf32>
    %486 = vector.broadcast %485 : vector<8x1xf32> to vector<8x32xf32>
    %487 = arith.subf %481, %486 : vector<8x32xf32>
    %488 = arith.mulf %487, %487 : vector<8x32xf32>
    %cst_142 = arith.constant dense<0.000000e+00> : vector<8xf32>
    %489 = vector.multi_reduction <add>, %488, %cst_142 [1] : vector<8x32xf32> to vector<8xf32>
    %490 = vector.shape_cast %489 : vector<8xf32> to vector<8x1xf32>
    %cst_143 = arith.constant 3.200000e+01 : f32
    %491 = vector.broadcast %cst_143 : f32 to vector<8x1xf32>
    %492 = arith.divf %490, %491 : vector<8x1xf32>
    %493 = vector.broadcast %485 : vector<8x1xf32> to vector<8x32xf32>
    %494 = arith.subf %481, %493 : vector<8x32xf32>
    %cst_144 = arith.constant 9.99999997E-7 : f32
    %495 = vector.broadcast %cst_144 : f32 to vector<8x1xf32>
    %496 = arith.addf %492, %495 : vector<8x1xf32>
    %497 = math.rsqrt %496 : vector<8x1xf32>
    %498 = vector.broadcast %497 : vector<8x1xf32> to vector<8x32xf32>
    %499 = arith.mulf %494, %498 : vector<8x32xf32>
    %c0_145 = arith.constant 0 : index
    %c0_146 = arith.constant 0 : index
    %500 = vector.load %arg21[%c0_145, %c0_146] : memref<1x32xf32, #tpu.memory_space<vmem>>, vector<1x32xf32>
    %501 = vector.broadcast %500 : vector<1x32xf32> to vector<8x32xf32>
    %502 = arith.mulf %499, %501 : vector<8x32xf32>
    %c0_147 = arith.constant 0 : index
    %c0_148 = arith.constant 0 : index
    %503 = vector.load %arg22[%c0_147, %c0_148] : memref<1x32xf32, #tpu.memory_space<vmem>>, vector<1x32xf32>
    %504 = vector.broadcast %503 : vector<1x32xf32> to vector<8x32xf32>
    %505 = arith.addf %502, %504 : vector<8x32xf32>
    %c0_149 = arith.constant 0 : index
    %c0_150 = arith.constant 0 : index
    %c0_151 = arith.constant 0 : index
    %506 = vector.load %arg23[%c0_149, %c0_150, %c0_151] : memref<1x8x32xf32, #tpu.memory_space<vmem>>, vector<1x8x32xf32>
    %507 = vector.shape_cast %506 : vector<1x8x32xf32> to vector<8x32xf32>
    %508 = vector.shape_cast %505 : vector<8x32xf32> to vector<1x8x32xf32>
    tpu.vector_store %arg23[%c0_149, %c0_150, %c0_151], %508 {strides = array<i32>} : memref<1x8x32xf32, #tpu.memory_space<vmem>>, vector<1x8x32xf32>,
    return
  }
  func.func @transform_0(%arg0: i32, %arg1: i32) -> (i32, i32, i32) {
    %c0_i32 = arith.constant 0 : i32
    %c0_i32_0 = arith.constant 0 : i32
    return %arg0, %arg1, %c0_i32 : i32, i32, i32
  }
  func.func @transform_1(%arg0: i32, %arg1: i32) -> (i32, i32, i32) {
    %c0_i32 = arith.constant 0 : i32
    %c0_i32_0 = arith.constant 0 : i32
    %c0_i32_1 = arith.constant 0 : i32
    return %arg0, %c0_i32, %c0_i32_0 : i32, i32, i32
  }
  func.func @transform_2(%arg0: i32, %arg1: i32) -> (i32, i32, i32) {
    %c0_i32 = arith.constant 0 : i32
    %c0_i32_0 = arith.constant 0 : i32
    return %arg0, %arg1, %c0_i32 : i32, i32, i32
  }
  func.func @transform_3(%arg0: i32, %arg1: i32) -> (i32, i32, i32) {
    %c0_i32 = arith.constant 0 : i32
    %c0_i32_0 = arith.constant 0 : i32
    %c0_i32_1 = arith.constant 0 : i32
    return %arg0, %c0_i32, %c0_i32_0 : i32, i32, i32
  }
  func.func @transform_4(%arg0: i32, %arg1: i32) -> (i32, i32) {
    %c0_i32 = arith.constant 0 : i32
    %c0_i32_0 = arith.constant 0 : i32
    %c0_i32_1 = arith.constant 0 : i32
    return %c0_i32, %c0_i32_0 : i32, i32
  }
  func.func @transform_5(%arg0: i32, %arg1: i32) -> (i32, i32) {
    %c0_i32 = arith.constant 0 : i32
    %c0_i32_0 = arith.constant 0 : i32
    %c0_i32_1 = arith.constant 0 : i32
    return %c0_i32, %c0_i32_0 : i32, i32
  }
  func.func @transform_6(%arg0: i32, %arg1: i32) -> (i32, i32) {
    %c0_i32 = arith.constant 0 : i32
    %c0_i32_0 = arith.constant 0 : i32
    %c0_i32_1 = arith.constant 0 : i32
    return %c0_i32, %c0_i32_0 : i32, i32
  }
  func.func @transform_7(%arg0: i32, %arg1: i32) -> (i32, i32) {
    %c0_i32 = arith.constant 0 : i32
    %c0_i32_0 = arith.constant 0 : i32
    %c0_i32_1 = arith.constant 0 : i32
    return %c0_i32, %c0_i32_0 : i32, i32
  }
  func.func @transform_8(%arg0: i32, %arg1: i32) -> (i32, i32) {
    %c0_i32 = arith.constant 0 : i32
    %c0_i32_0 = arith.constant 0 : i32
    %c0_i32_1 = arith.constant 0 : i32
    return %c0_i32, %c0_i32_0 : i32, i32
  }
  func.func @transform_9(%arg0: i32, %arg1: i32) -> (i32, i32) {
    %c0_i32 = arith.constant 0 : i32
    %c0_i32_0 = arith.constant 0 : i32
    %c0_i32_1 = arith.constant 0 : i32
    return %c0_i32, %c0_i32_0 : i32, i32
  }
  func.func @transform_10(%arg0: i32, %arg1: i32) -> (i32, i32) {
    %c0_i32 = arith.constant 0 : i32
    %c0_i32_0 = arith.constant 0 : i32
    %c0_i32_1 = arith.constant 0 : i32
    return %c0_i32, %c0_i32_0 : i32, i32
  }
  func.func @transform_11(%arg0: i32, %arg1: i32) -> (i32, i32) {
    %c0_i32 = arith.constant 0 : i32
    %c0_i32_0 = arith.constant 0 : i32
    %c0_i32_1 = arith.constant 0 : i32
    return %c0_i32, %c0_i32_0 : i32, i32
  }
  func.func @transform_12(%arg0: i32, %arg1: i32) -> (i32, i32) {
    %c0_i32 = arith.constant 0 : i32
    %c0_i32_0 = arith.constant 0 : i32
    %c0_i32_1 = arith.constant 0 : i32
    return %c0_i32, %c0_i32_0 : i32, i32
  }
  func.func @transform_13(%arg0: i32, %arg1: i32) -> (i32, i32) {
    %c0_i32 = arith.constant 0 : i32
    %c0_i32_0 = arith.constant 0 : i32
    %c0_i32_1 = arith.constant 0 : i32
    return %c0_i32, %c0_i32_0 : i32, i32
  }
  func.func @transform_14(%arg0: i32, %arg1: i32) -> (i32, i32) {
    %c0_i32 = arith.constant 0 : i32
    %c0_i32_0 = arith.constant 0 : i32
    %c0_i32_1 = arith.constant 0 : i32
    return %c0_i32, %c0_i32_0 : i32, i32
  }
  func.func @transform_15(%arg0: i32, %arg1: i32) -> (i32, i32) {
    %c0_i32 = arith.constant 0 : i32
    %c0_i32_0 = arith.constant 0 : i32
    %c0_i32_1 = arith.constant 0 : i32
    return %c0_i32, %c0_i32_0 : i32, i32
  }
  func.func @transform_16(%arg0: i32, %arg1: i32) -> (i32, i32) {
    %c0_i32 = arith.constant 0 : i32
    %c0_i32_0 = arith.constant 0 : i32
    %c0_i32_1 = arith.constant 0 : i32
    return %c0_i32, %c0_i32_0 : i32, i32
  }
  func.func @transform_17(%arg0: i32, %arg1: i32) -> (i32, i32) {
    %c0_i32 = arith.constant 0 : i32
    %c0_i32_0 = arith.constant 0 : i32
    %c0_i32_1 = arith.constant 0 : i32
    return %c0_i32, %c0_i32_0 : i32, i32
  }
  func.func @transform_18(%arg0: i32, %arg1: i32) -> (i32, i32) {
    %c0_i32 = arith.constant 0 : i32
    %c0_i32_0 = arith.constant 0 : i32
    %c0_i32_1 = arith.constant 0 : i32
    return %c0_i32, %c0_i32_0 : i32, i32
  }
  func.func @transform_19(%arg0: i32, %arg1: i32) -> (i32, i32) {
    %c0_i32 = arith.constant 0 : i32
    %c0_i32_0 = arith.constant 0 : i32
    %c0_i32_1 = arith.constant 0 : i32
    return %c0_i32, %c0_i32_0 : i32, i32
  }
  func.func @transform_20(%arg0: i32, %arg1: i32) -> (i32, i32) {
    %c0_i32 = arith.constant 0 : i32
    %c0_i32_0 = arith.constant 0 : i32
    %c0_i32_1 = arith.constant 0 : i32
    return %c0_i32, %c0_i32_0 : i32, i32
  }
  func.func @transform_21(%arg0: i32, %arg1: i32) -> (i32, i32, i32) {
    %c0_i32 = arith.constant 0 : i32
    %c0_i32_0 = arith.constant 0 : i32
    return %arg0, %arg1, %c0_i32 : i32, i32, i32
  }
}

</mosaic_0001>

<bundles_post_ra>
// kernel: tpu_custom_call.1
= control target key start
LH: loop header
LB: loop body
LE: loop exit
PB: predicated region body
PF: predicated region fallthrough
CT: control target
= control target key end

     0   :  { %s3834_s0 = inlined_call_operand.vmem [shape: f32[2,16,32], index: 0, kind: input, shape index: {}]   ;;  %s3835_s1 = inlined_call_operand.vmem [shape: f32[2,16,32], index: 1, kind: input, shape index: {}]   ;;  %s3836_s2 = inlined_call_operand.vmem [shape: s32[2,16,16], index: 2, kind: input, shape index: {}]   ;;  %s3837_s3 = inlined_call_operand.vmem [shape: f32[2,1,16], index: 3, kind: input, shape index: {}]   ;;  %s3838_s4 = inlined_call_operand.vmem [shape: f32[12,4], index: 4, kind: input, shape index: {}]   ;;  %s3839_s5 = inlined_call_operand.hbm [shape: f32[32,32], index: 5, kind: input, shape index: {}]   ;;  %s3840_s6 = inlined_call_operand.hbm [shape: f32[32,32], index: 6, kind: input, shape index: {}]   ;;  %s3841_s7 = inlined_call_operand.hbm [shape: f32[32,32], index: 7, kind: input, shape index: {}]   ;;  %s3842_s8 = inlined_call_operand.vmem [shape: f32[1,32], index: 8, kind: input, shape index: {}]   ;;  %s3843_s9 = inlined_call_operand.vmem [shape: f32[1,32], index: 9, kind: input, shape index: {}]   ;;  %s3844_s10 = inlined_call_operand.hbm [shape: f32[1,32], index: 10, kind: input, shape index: {}]   ;;  %s3845_s11 = inlined_call_operand.hbm [shape: f32[32,32], index: 11, kind: input, shape index: {}]   ;;  %s3846_s12 = inlined_call_operand.hbm [shape: f32[1,32], index: 12, kind: input, shape index: {}]   ;;  %s3847_s13 = inlined_call_operand.hbm [shape: f32[1,32], index: 13, kind: input, shape index: {}]   ;;  %s3848_s14 = inlined_call_operand.hbm [shape: f32[1,32], index: 14, kind: input, shape index: {}]   ;;  %s3849_s15 = inlined_call_operand.hbm [shape: f32[32,64], index: 15, kind: input, shape index: {}]   ;;  %s3850_s16 = inlined_call_operand.hbm [shape: f32[1,64], index: 16, kind: input, shape index: {}]   ;;  %s3851_s17 = inlined_call_operand.vmem [shape: f32[64,32], index: 17, kind: input, shape index: {}]   ;;  %s3852_s18 = inlined_call_operand.vmem [shape: f32[1,32], index: 18, kind: input, shape index: {}]   ;;  %s3853_s19 = inlined_call_operand.hbm [shape: f32[1,32], index: 19, kind: input, shape index: {}]   ;;  %s3854_s20 = inlined_call_operand.vmem [shape: f32[1,32], index: 20, kind: input, shape index: {}]   ;;  %s3855_s21 = inlined_call_operand.hbm [shape: f32[2,16,32], index: 21, kind: output, shape index: {}]  }
   0x1   :  { %3873 = sst [smem:[#allocation41_spill]] %s3834_s0 }
   0x2   :  { %3874 = sst [smem:[#allocation42_spill]] %s3835_s1 }
   0x3   :  { %3875 = sst [smem:[#allocation43_spill]] %s3836_s2 }
   0x4   :  { %3876 = sst [smem:[#allocation44_spill]] %s3837_s3 }
   0x5   :  { %3877 = sst [smem:[#allocation45_spill]] %s3838_s4 }
   0x6   :  { %3878 = sst [smem:[#allocation46_spill]] %s3839_s5 }
   0x7   :  { %3879 = sst [smem:[#allocation47_spill]] %s3840_s6 }
   0x8   :  { %3880 = sst [smem:[#allocation48_spill]] %s3841_s7 }
   0x9   :  { %3881 = sst [smem:[#allocation49_spill]] %s3844_s10 }
   0xa   :  { %3882 = sst [smem:[#allocation50_spill]] %s3845_s11 }
   0xb   :  { %3883 = sst [smem:[#allocation51_spill]] %s3846_s12 }
   0xc   :  { %3884 = sst [smem:[#allocation52_spill]] %s3847_s13 }
   0xd   :  { %3885 = sst [smem:[#allocation53_spill]] %s3848_s14 }
   0xe   :  { %3886 = sst [smem:[#allocation54_spill]] %s3851_s17 }
   0xf   :  { %3887 = sst [smem:[#allocation55_spill]] %s3852_s18 }
  0x10   :  { %3888 = sst [smem:[#allocation56_spill]] %s3854_s20 }
  0x11   :  { %3889 = sst [smem:[#allocation57_spill]] %s3855_s21 }
  0x12   :  { %26 = vsyncpa [#allocation6], 0 }
  0x13   :  { %27 = vsyncpa [#allocation9], 0 }
  0x14   :  { %28 = vsyncpa [#allocation12], 0 }
  0x15   :  { %29 = vsyncpa [#allocation15], 0 }
  0x16   :  { %30 = vsyncpa [#allocation18], 0 }
  0x17   :  { %31 = vsyncpa [#allocation21], 0 }
  0x18   :  { %32 = vsyncpa [#allocation7], 0 }
  0x19   :  { %34 = vsyncpa [#allocation7 + $0x1], 0  ;;  %s3175_s2 = smov 0   ;;  %s3177_s25 = smov 0  }
  0x1a   :  { %s3179_s26 = smov 0   ;;  %s3181_s27 = smov 0  }
  0x1b   :  { %s3183_s3 = smov 0   ;;  %s3185_s28 = smov 0  }
  0x1c   :  { %s3187_s29 = smov 0   ;;  %s3189_s0 = smov 0  }
  0x1d LB: > { %3890 = sst [smem:[#allocation31_spill]] %s3012_s2  ;;  %s2176_s4 = sadd.s32 4294967295, %s3040_s0   ;;  %s3040_s0 = sphi %s3189_s0, %s40_s0   ;;  %s3036_s29 = sphi %s3187_s29, %s3938_s29   ;;  %s3032_s28 = sphi %s3185_s28, %s3937_s28   ;;  %s3028_s3 = sphi %s3183_s3, %s3936_s3   ;;  %s3024_s27 = sphi %s3181_s27, %s3935_s27   ;;  %s3020_s26 = sphi %s3179_s26, %s3934_s26   ;;  %s3016_s25 = sphi %s3177_s25, %s3940_s25   ;;  %s3012_s2 = sphi %s3175_s2, %s3939_s2  }
  0x1e   : > { %3891 = sst [smem:[#allocation32_spill]] %s3020_s26  ;;  %s2177_s30 = sadd.s32 4294967294, %s3040_s0  }
  0x1f   : > { %3892 = sst [smem:[#allocation33_spill]] %s3032_s28  ;;  %s49_s5 = sadd.s32 1, %s3032_s28 }
  0x20   : > { %3893 = sst [smem:[#allocation34_spill]] %s3036_s29  ;;  %s52_s22 = sadd.s32 1, %s3036_s29 }
  0x21   : > { %3894 = sst [smem:[#allocation35_spill]] %s3040_s0  ;;  %p50_p0 = scmp.ge.s32.totalorder %s49_s5, 2 }
  0x22   : > { %s526_s23 = sadd.s32 1, %s3020_s26  ;;  %p536_p1 = scmp.ne.s32.totalorder %s3020_s26, %s3016_s25 }
  0x23   : > { %p537_p2 = scmp.eq.s32.totalorder %s2176_s4, 3  ;;  %s3942_s5 = smov (%p50_p0, %s49_s5), 0 }
  0x24   : > { %3895 = sst [smem:[#allocation36_spill]] %s3942_s5  ;;  %s3944_s22 = smov (!%p50_p0, %s52_s22), %s3036_s29 }
  0x25   : > { %s522_s1 = ssub.s32 %s3032_s28, %s3942_s5  ;;  %p3227_p3 = por %p537_p2, %p536_p1 }
  0x26   : > { %p54_p4 = scmp.ge.s32.totalorder %s3944_s22, 2  ;;  %p542_p5 = scmp.ne.s32.totalorder %s3016_s25, %s3012_s2 }
  0x27   : > { %s3896_s24 = scalar_select %p3227_p3, 1, 0 }
  0x28   : > { %p543_p6 = scmp.eq.s32.totalorder %s2177_s30, 3  ;;  %p2178_p7 = scmp.ge.s32.totalorder %s3040_s0, 1 }
  0x29   : > { %3897 = sst [smem:[#allocation37_spill]] %s3896_s24  ;;  %s3946_s22 = smov (%p54_p4, %s3944_s22), 0 }
  0x2a   : > { %3898 = sst [smem:[#allocation38_spill]] %s3946_s22  ;;  %p3236_p8 = por %p543_p6, %p542_p5 }
  0x2b   : > { %p550_p9 = scmp.lt.s32.totalorder %s3040_s0, 5  ;;  %s521_s21 = ssub.s32 %s3036_s29, %s3946_s22 }
  0x2c   : > { %s3899_s20 = scalar_select %p3236_p8, 1, 0 }
  0x2d   : > { %s523_s18 = sor.u32 %s522_s1, %s521_s21  ;;  %p3243_p10 = pnand %p2178_p7, %p550_p9 }
  0x2e   : > { %3900 = sst [smem:[#allocation39_spill]] %s3899_s20  ;;  %p524_p11 = scmp.eq.s32.totalorder %s523_s18, 0 }
  0x2f   : > { %p3247_p12 = scmp.eq.s32.totalorder %s2176_s4, 0  ;;  %p2391_p13 = pneg %p3243_p10 }
  0x30   : > { %s3254_s30 = scalar_select %p524_p11, %s3020_s26, %s526_s23  }
  0x31   : > { %p3258_p0 = pnand %p3247_p12, %p2391_p13  ;;  %s3905_s6 = sld [smem:[#allocation47_spill]] }
  0x32   : > { %3903 = sst [smem:[#allocation40_spill]] %s3254_s30  ;;  %s3042_s4 = smov [#allocation8]  }
  0x33   : > { %s580_s22 = sshll.u32 %s3042_s4, 4  ;;  %s3906_s10 = sld [smem:[#allocation49_spill]]  ;;  %s581_s22 = int_to_ptr.vmem [resolvable:$true] %s580_s22 }
  0x34   : > { %s3870_s23 = smov 128   ;;  %s3044_s30 = smov 8  }
  0x35   : > { %s3907_s12 = sld [smem:[#allocation51_spill]]  ;;  %s3045_s26 = smov [#allocation11]  }
  0x36   : > { %s615_s4 = sshll.u32 %s3045_s26, 4  ;;  %s3046_s2 = smov [#allocation14]   ;;  %s616_s4 = int_to_ptr.vmem [resolvable:$true] %s615_s4 }
  0x37   : > { %s578_s18 = sshll.u32 %s3905_s6, 4  ;;  %s641_s29 = sshll.u32 %s3046_s2, 4  ;;  %s579_s18 = int_to_ptr.hbm [resolvable:$true] %s578_s18  ;;  %s642_s29 = int_to_ptr.vmem [resolvable:$true] %s641_s29 }
  0x38   : > { %2397 = dma.hbm_to_vmem [thread:$0]  (!%p3258_p0), %s579_s18, 512, %s581_s22, [#allocation9], %s3870_s23, %s3870_s23, %s3044_s30  }
  0x39   : > { %s613_s0 = sshll.u32 %s3906_s10, 4  ;;  %s3908_s14 = sld [smem:[#allocation53_spill]]  ;;  %s614_s0 = int_to_ptr.hbm [resolvable:$true] %s613_s0 }
  0x3a   : > { %2403 = dma.hbm_to_vmem [thread:$0]  (!%p3258_p0), %s614_s0, 16, %s616_s4, [#allocation12]  }
  0x3b   : > { %s639_s6 = sshll.u32 %s3907_s12, 4  ;;  %s689_s21 = sshll.u32 %s3850_s16, 4  ;;  %s640_s6 = int_to_ptr.hbm [resolvable:$true] %s639_s6  ;;  %s690_s21 = int_to_ptr.hbm [resolvable:$true] %s689_s21 }
  0x3c   : > { %2409 = dma.hbm_to_vmem [thread:$0]  (!%p3258_p0), %s640_s6, 16, %s642_s29, [#allocation15]  }
  0x3d   : > { %s3047_s26 = smov [#allocation17]   ;;  %s3048_s0 = smov [#allocation20]  }
  0x3e   : > { %s665_s1 = sshll.u32 %s3047_s26, 4  ;;  %s691_s4 = sshll.u32 %s3048_s0, 4  ;;  %s666_s1 = int_to_ptr.vmem [resolvable:$true] %s665_s1  ;;  %s692_s4 = int_to_ptr.vmem [resolvable:$true] %s691_s4 }
  0x3f   : > { %s663_s17 = sshll.u32 %s3908_s14, 4  ;;  %s3909_s6 = sld [smem:[#allocation46_spill]]  ;;  %s664_s17 = int_to_ptr.hbm [resolvable:$true] %s663_s17 }
  0x40   : > { %2415 = dma.hbm_to_vmem [thread:$0]  (!%p3258_p0), %s664_s17, 16, %s666_s1, [#allocation18]  }
  0x41   : > { %2421 = dma.hbm_to_vmem [thread:$0]  (!%p3258_p0), %s690_s21, 16, %s692_s4, [#allocation21]  }
  0x42   : > { %s3049_s29 = smov [#allocation5]   ;;  %s3910_s7 = sld [smem:[#allocation48_spill]] }
  0x43   : > { %s566_s22 = sshll.u32 %s3049_s29, 4  ;;  %s3911_s17 = smov 128   ;;  %s567_s22 = int_to_ptr.vmem [resolvable:$true] %s566_s22 }
  0x44   : > { %s3050_s21 = smov [#allocation10]   ;;  %s3912_s11 = sld [smem:[#allocation50_spill]] }
  0x45   : > { %s564_s2 = sshll.u32 %s3909_s6, 4  ;;  %s594_s1 = sshll.u32 %s3050_s21, 4  ;;  %s565_s2 = int_to_ptr.hbm [resolvable:$true] %s564_s2  ;;  %s595_s1 = int_to_ptr.vmem [resolvable:$true] %s594_s1 }
  0x46   : > { %2394 = dma.hbm_to_vmem [thread:$0]  (!%p3258_p0), %s565_s2, 512, %s567_s22, [#allocation6], %s3911_s17, %s3911_s17, %s3044_s30  }
  0x47   : > { %s3913_s13 = sld [smem:[#allocation52_spill]]  ;;  %s3051_s2 = smov [#allocation13]  }
  0x48   : > { %s592_s23 = sshll.u32 %s3910_s7, 4  ;;  %s626_s22 = sshll.u32 %s3051_s2, 4  ;;  %s593_s23 = int_to_ptr.hbm [resolvable:$true] %s592_s23  ;;  %s627_s22 = int_to_ptr.vmem [resolvable:$true] %s626_s22 }
  0x49   : > { %2400 = dma.hbm_to_vmem [thread:$0]  (!%p3258_p0), %s593_s23, 512, %s595_s1, [#allocation9], %s3911_s17, %s3911_s17, %s3044_s30  }
  0x4a   : > { %s624_s10 = sshll.u32 %s3912_s11, 4  ;;  %s3052_s18 = smov [#allocation16]   ;;  %s625_s10 = int_to_ptr.hbm [resolvable:$true] %s624_s10 }
  0x4b   : > { %2406 = dma.hbm_to_vmem [thread:$0]  (!%p3258_p0), %s625_s10, 512, %s627_s22, [#allocation12], %s3911_s17, %s3911_s17, %s3044_s30  }
  0x4c   : > { %s653_s26 = sshll.u32 %s3052_s18, 4  ;;  %s674_s23 = sshll.u32 %s3849_s15, 4  ;;  %s654_s26 = int_to_ptr.vmem [resolvable:$true] %s653_s26  ;;  %s675_s23 = int_to_ptr.hbm [resolvable:$true] %s674_s23 }
  0x4d   : > { %s651_s29 = sshll.u32 %s3913_s13, 4  ;;  %s707_s24 = sshll.u32 %s3853_s19, 4  ;;  %s652_s29 = int_to_ptr.hbm [resolvable:$true] %s651_s29  ;;  %s708_s24 = int_to_ptr.hbm [resolvable:$true] %s707_s24 }
  0x4e   : > { %2412 = dma.hbm_to_vmem [thread:$0]  (!%p3258_p0), %s652_s29, 16, %s654_s26, [#allocation15]  }
  0x4f   : > { %s3053_s6 = smov [#allocation19]   ;;  %s3054_s10 = smov [#allocation22]  }
  0x50   : > { %s676_s2 = sshll.u32 %s3053_s6, 4  ;;  %s709_s22 = sshll.u32 %s3054_s10, 4  ;;  %s677_s2 = int_to_ptr.vmem [resolvable:$true] %s676_s2  ;;  %s710_s22 = int_to_ptr.vmem [resolvable:$true] %s709_s22 }
  0x51   : > { %2418 = dma.hbm_to_vmem [thread:$0]  (!%p3258_p0), %s675_s23, 512, %s677_s2, [#allocation18], %s3911_s17, %s3911_s17, %s3044_s30  }
  0x52   : > { %2424 = dma.hbm_to_vmem [thread:$0]  (!%p3258_p0), %s708_s24, 16, %s710_s22, [#allocation21]  }
  0x53   : > { %761 = sbr.rel (%p3243_p10) target bundleno = 2186 (0x88a), region = 104 }
  0x58   : > { %2983 = dma.done.wait (%p3247_p12), [#allocation6], 512  }
  0x59   : > { %2985 = vsyncadd (%p3247_p12), [#allocation6], 4294966784 }
  0x5a   : > { %2987 = dma.done.wait (%p3247_p12), [#allocation9], 1024  }
  0x5b   : > { %2989 = vsyncadd (%p3247_p12), [#allocation9], 4294966272 }
  0x5c   : > { %2991 = dma.done.wait (%p3247_p12), [#allocation12], 528  }
  0x5d   : > { %2993 = vsyncadd (%p3247_p12), [#allocation12], 4294966768 }
  0x5e   : > { %2995 = dma.done.wait (%p3247_p12), [#allocation15], 32  }
  0x5f   : > { %2997 = vsyncadd (%p3247_p12), [#allocation15], 4294967264 }
  0x60   : > { %2999 = dma.done.wait (%p3247_p12), [#allocation18], 528  }
  0x61   : > { %3001 = vsyncadd (%p3247_p12), [#allocation18], 4294966768 }
  0x62   : > { %3003 = dma.done.wait (%p3247_p12), [#allocation21], 32  }
  0x63   : > { %3005 = vsyncadd (%p3247_p12), [#allocation21], 4294967264  ;;  %s3872_s20 = sand.u32 1, %s3016_s25   ;;  %p891_p1 = scmp.lt.s32.totalorder %s3028_s3, 1 }
  0x64   : > { %s3362_s5 = sshll.u32 %s3872_s20, 3  ;;  %p893_p2 = scmp.lt.s32.totalorder %s3024_s27, 1 }
  0x65   : > { %s3366_s30 = scalar_select %p891_p1, %s3028_s3, 1 }
  0x66   : > { %s894_s28 = scalar_select %p893_p2, %s3024_s27, 1 }
  0x67   : > { %s2204_s17 = sshll.u32 %s3366_s30, 1  ;;  %s2240_s29 = sshll.u32 %s3366_s30, 4 }
  0x68   : > { %s896_s18 = sadd.s32 %s2204_s17, %s894_s28  ;;  %s3914_s0 = sld [smem:[#allocation42_spill]] }
  0x69   : > { %s2205_s1 = sshll.u32 %s896_s18, 3  ;;  %s3915_s6 = sld [smem:[#allocation44_spill]] }
  0x6a   : > { %s3916_s20 = sld [smem:[#allocation41_spill]]  ;;  %s890_s28 = scalar_lea.vmem [#allocation23], %s3362_s5 }
  0x6b   : > { %s3917_s13 = sld [smem:[#allocation43_spill]]  ;;  %p2210_p4 = scmp.ne.s32.totalorder %s3024_s27, 0 }
  0x6d   : > { %918 = sbr.rel (%p2210_p4) target bundleno = 258 (0x102), region = 152 }
  0x6e   : > { %s3374_s23 = scalar_lea.vmem %s3914_s0, %s2240_s29 }
  0x6f   : > { %s914_s2 = scalar_lea.vmem %s3915_s6, %s3366_s30 }
  0x70   : > { %s3383_s7 = scalar_lea.vmem %s3916_s20, %s2205_s1 }
  0x71   : > { %s3388_s14 = scalar_lea.vmem %s3917_s13, %s2205_s1 }
  0x72   : > { %v924_v0 = vld [vmem:[#allocation8 + $0x18] sm:$0xff]  ;;  %v923_v2 = vld [vmem:[#allocation8 + $0x10] sm:$0xff]  ;;  %v922_v4 = vld [vmem:[#allocation8 + $0x8] sm:$0xff]  ;;  %vm929_vm0 = vcmask 261120  }
  0x73   : > { %v964_v1 = vld [vmem:[#allocation10 + $0x18] sm:$0xff]  ;;  %2241 = vmatpush.msra.mxu2 %v924_v0  ;;  %v963_v3 = vld [vmem:[#allocation10 + $0x10] sm:$0xff]  ;;  %v962_v5 = vld [vmem:[#allocation10 + $0x8] sm:$0xff]  ;;  %948 = vmatpush.msra.mxu0 %v924_v0 }
  0x74   : > { %2245 = vmatpush.msra.mxu3 %v964_v1  ;;  %981 = vmatpush.msra.mxu1 %v964_v1  ;;  %v921_v6 = vld [vmem:[#allocation8] sm:$0xff]  ;;  %v919_v9 = vld [vmem:[%s3374_s23] sm:$0xff] }
  0x75   : > { %2242 = vmatpush.msra.mxu2 %v923_v2  ;;  %v961_v7 = vld [vmem:[#allocation10] sm:$0xff]  ;;  %949 = vmatpush.msra.mxu0 %v923_v2  ;;  %v2539_v10 = vld [vmem:[%s3843_s9] ss:$0 sm:$0xff] }
  0x76   : > { %2246 = vmatpush.msra.mxu3 %v963_v3  ;;  %982 = vmatpush.msra.mxu1 %v963_v3  ;;  %v920_v8 = vld [vmem:[%s3374_s23 + $0x8] sm:$0xff] }
  0x77   : > { %2243 = vmatpush.msra.mxu2 %v922_v4  ;;  %950 = vmatpush.msra.mxu0 %v922_v4  ;;  %v2540_v11 = vld [vmem:[#allocation11] ss:$0 sm:$0xff] }
  0x78   : > { %2247 = vmatpush.msra.mxu3 %v962_v5  ;;  %983 = vmatpush.msra.mxu1 %v962_v5 }
  0x79   : > { %2244 = vmatpush.msra.mxu2 %v921_v6  ;;  %951 = vmatpush.msra.mxu0 %v921_v6 }
  0x7a   : > { %2248 = vmatpush.msra.mxu3 %v961_v7  ;;  %2212 = vmatmul.msk.f32.vlgmr.msra.gmra.mxu2 %vm929_vm0, %v920_v8 }
  0x7b   : > { %2214 = vmatmul.msk.f32.vlgmr.msra.gmra.mxu3 %vm929_vm0, %v920_v8  ;;  %984 = vmatpush.msra.mxu1 %v961_v7 }
  0x7c   : > { %2211 = vmatmul.msk.f32.vlgmr.msra.gmra.mxu0 %vm929_vm0, %v919_v9  ;;  %2213 = vmatmul.msk.f32.vlgmr.msra.gmra.mxu1 %vm929_vm0, %v919_v9 }
  0xf9   : > { %v953_v12 = vpop.f32.mrf.mxu0  ;;  %v986_v13 = vpop.f32.mrf.mxu1 }
  0xfa   : > { %v954_v14 = vadd.f32 %v2539_v10, %v953_v12  ;;  %v987_v15 = vadd.f32 %v2540_v11, %v986_v13 }
  0xfc   : > { %959 = vst.msk [vmem:[#allocation2] sm:$0xff] %vm929_vm0, %v954_v14 }
  0xfd   : > { %v956_v16 = vpop.f32.mrf.mxu2  ;;  %992 = vst.msk [vmem:[#allocation3] sm:$0xff] %vm929_vm0, %v987_v15 }
  0xfe   : > { %v989_v17 = vpop.f32.mrf.mxu3  ;;  %v957_v18 = vadd.f32 %v2539_v10, %v956_v16 }
  0xff   : > { %v990_v19 = vadd.f32 %v2540_v11, %v989_v17 }
 0x100   : > { %960 = vst.msk [vmem:[#allocation2 + $0x8] sm:$0xff] %vm929_vm0, %v957_v18 }
 0x101   : > { %993 = vst.msk [vmem:[#allocation3 + $0x8] sm:$0xff] %vm929_vm0, %v990_v19 }
 0x102 PF: > { %v998_v20 = vld [vmem:[#allocation5 + $0x18] sm:$0xff]  ;;  %v997_v21 = vld [vmem:[#allocation5 + $0x10] sm:$0xff]  ;;  %v996_v22 = vld [vmem:[#allocation5 + $0x8] sm:$0xff]  ;;  %s3055_s13 = smov 104   ;;  %s3918_s29 = sld [smem:[#allocation45_spill]]  ;;  %vm1042_vm1 = vcmask 64512  }
 0x103   : > { %1019 = vmatpush.msra.mxu0 %v998_v20  ;;  %v1199_v24 = vld [vmem:[#allocation2] sm:$0xff]  ;;  %s3056_s26 = smov 120   ;;  %v995_v26 = vld [vmem:[#allocation5] sm:$0xff]  ;;  %vm1003_vm2 = vcmask 261120   ;;  %s3057_s21 = smov 127  }
 0x104   : > { %v994_v27 = vld [vmem:[%s3383_s7] sm:$0xff]  ;;  %1207 = vrot.lane.b32.xlu1 %v1199_v24, %s3056_s26  ;;  %s3058_s0 = smov 112   ;;  %s3059_s6 = smov 126  }
 0x105   : > { %1020 = vmatpush.msra.mxu0 %v997_v21  ;;  %v2556_v43 = vld [vmem:[%s3842_s8] ss:$0 sm:$0xff]  ;;  %s3060_s10 = smov 125  }
 0x106   : > { %v1027_v48 = vld [vmem:[%s3388_s14] sm:$0xff] }
 0x107   : > { %v1548_v23 = vld [vmem:[#allocation2 + $0x8] sm:$0xff]  ;;  %1021 = vmatpush.msra.mxu0 %v996_v22  ;;  %v1029_v49 = vadd.s32 4294967253, %v1027_v48  ;;  %vm1032_vm4 = vcmp.lt.s32.totalorder %v1027_v48, 7  ;;  %vm1028_vm5 = vcmp.gt.s32.totalorder %v1027_v48, 50  ;;  %v3551_v20 = vld [vmem:[%s914_s2] ss:$0 sm:$0xff] }
 0x108   : > { %1557 = vrot.lane.b32.xlu2 %v1548_v23, %s3055_s13  ;;  %s3919_s18 = smov %s3918_s29  ;;  %v3409_v25 = vld [vmem:[%s3918_s29] sm:$0xff]  ;;  %1209 = vrot.lane.b32.xlu0 %v1548_v23, %s3056_s26  ;;  %v1033_v52 = vsel %vm1032_vm4, %v1027_v48, 7  ;;  %vm1150_vm4 = vcmask 130048  }
 0x109   : > { %v3415_v28 = vrot.slane %v3409_v25, 2  ;;  %v3418_v29 = vrot.slane %v3409_v25, 1  ;;  %2249 = vpush %v3409_v25  ;;  %2216 = vmatpush.xpose.msk.msra.mxu1 %vm1042_vm1, %v1548_v23  ;;  %1022 = vmatpush.msra.mxu0 %v995_v26  ;;  %v1104_v30 = vrot.slane %v3409_v25, 5  ;;  %v3438_v32 = vrot.slane %v3409_v25, 3  ;;  %v1037_v35 = vld [vmem:[%s3919_s18 + $0x8] sm:$0xf] }
 0x10a   : > { %2215 = vmatmul.msk.f32.vlgmr.msra.gmra.mxu0 %vm1003_vm2, %v994_v27  ;;  %v1098_v33 = vrot.slane %v3409_v25, 4  ;;  %v3442_v34 = vrot.slane %v3409_v25, 6  ;;  %v1116_v36 = vrot.slane %v3409_v25, 7  ;;  %v3452_v37 = vrot.slane %v1037_v35, 1  ;;  %v1041_v26 = vld [vmem:[#allocation3 + $0x8] sm:$0xff]  ;;  %v1040_v27 = vld [vmem:[#allocation3] sm:$0xff] }
 0x10b   : > { %2251 = vpush %v3418_v29  ;;  %v3455_v38 = vrot.slane %v1037_v35, 2  ;;  %v1140_v39 = vrot.slane %v1037_v35, 3  ;;  %vm1030_vm3 = vcmp.lt.s32.totalorder %v1029_v49, 11  ;;  %1177 = vmatpush.msra.mxu2 %v1041_v26  ;;  %v3586_v48 = vpack.i.bf16 %v1040_v27, %v1041_v26 }
 0x10c   : > { %2253 = vpush %v3415_v28  ;;  %1381 = vrot.lane.b32.xlu1 %v1199_v24, %s3058_s0  ;;  %v1031_v51 = vsel %vm1030_vm3, %v1029_v49, 11 }
 0x10d   : > { %2217 = vmatpush.xpose.msk.msra.mxu1 %vm1042_vm1, %v1199_v24  ;;  %2255 = vpush %v3438_v32  ;;  %v3500_v53 = vsel %vm1028_vm5, %v1031_v51, %v1033_v52  ;;  %1178 = vmatpush.msra.mxu2 %v1040_v27 }
 0x10e   : > { %2257 = vpush %v1098_v33  ;;  %vm1073_vm6 = vcmp.eq.s32.totalorder %v3500_v53, 0  ;;  %vm1079_vm7 = vcmp.eq.s32.totalorder %v3500_v53, 1  ;;  %vm1085_vm8 = vcmp.eq.s32.totalorder %v3500_v53, 2  ;;  %vm1091_vm9 = vcmp.eq.s32.totalorder %v3500_v53, 3 }
 0x10f   : > { %2259 = vpush %v1104_v30  ;;  %vm1097_vm10 = vcmp.eq.s32.totalorder %v3500_v53, 4  ;;  %vm1103_vm11 = vcmp.eq.s32.totalorder %v3500_v53, 5  ;;  %vm1109_vm12 = vcmp.eq.s32.totalorder %v3500_v53, 6  ;;  %vm1115_vm13 = vcmp.eq.s32.totalorder %v3500_v53, 7 }
 0x110   : > { %1555 = vrot.lane.b32.xlu2 %v1199_v24, %s3055_s13  ;;  %1238 = vrot.lane.b32.xlu0 %v3409_v25, %s3057_s21  ;;  %2261 = vpush %v3442_v34  ;;  %vm1121_vm14 = vcmp.eq.s32.totalorder %v3500_v53, 8  ;;  %vm1127_vm15 = vcmp.eq.s32.totalorder %v3500_v53, 9  ;;  %vm1133_vm0 = vcmp.eq.s32.totalorder %v3500_v53, 10  ;;  %vm1139_vm3 = vcmp.eq.s32.totalorder %v3500_v53, 11 }
 0x111   : > { %2263 = vpush %v1116_v36 }
 0x112   : > { %2265 = vpush %v1037_v35 }
 0x113   : > { %2267 = vpush %v3452_v37 }
 0x114   : > { %1244 = vrot.lane.b32.xlu1 %v3418_v29, %s3057_s21  ;;  %2269 = vpush %v3455_v38 }
 0x115   : > { %2271 = vpush %v1140_v39 }
 0x118   : > { %1383 = vrot.lane.b32.xlu2 %v1548_v23, %s3058_s0  ;;  %1256 = vrot.lane.b32.xlu0 %v3438_v32, %s3057_s21 }
 0x120   : > { %1250 = vrot.lane.b32.xlu2 %v3415_v28, %s3057_s21 }
 0x128   : > { %1268 = vrot.lane.b32.xlu2 %v1104_v30, %s3057_s21 }
 0x13a   : > { %s2250_s22 = spop %2249 }
 0x13b   : > { %v1076_v55 = vstv %s2250_s22 }
 0x13c   : > { %s2252_s14 = spop %2251  ;;  %v1078_v56 = vsel %vm1073_vm6, %v1076_v55, 0.0 }
 0x13d   : > { %v1082_v57 = vstv %s2252_s14  ;;  %s2254_s11 = spop %2253 }
 0x13e   : > { %v1084_v58 = vsel %vm1079_vm7, %v1082_v57, %v1078_v56  ;;  %v1088_v59 = vstv %s2254_s11  ;;  %s2256_s12 = spop %2255 }
 0x13f   : > { %v1090_v60 = vsel %vm1085_vm8, %v1088_v59, %v1084_v58  ;;  %v1094_v61 = vstv %s2256_s12  ;;  %s2258_s20 = spop %2257 }
 0x140   : > { %v1096_v62 = vsel %vm1091_vm9, %v1094_v61, %v1090_v60  ;;  %v1100_v63 = vstv %s2258_s20  ;;  %s2260_s17 = spop %2259 }
 0x141   : > { %v1102_v1 = vsel %vm1097_vm10, %v1100_v63, %v1096_v62  ;;  %v1106_v2 = vstv %s2260_s17  ;;  %s2262_s29 = spop %2261 }
 0x142   : > { %v1108_v3 = vsel %vm1103_vm11, %v1106_v2, %v1102_v1  ;;  %v1112_v4 = vstv %s2262_s29  ;;  %s2264_s23 = spop %2263 }
 0x143   : > { %v1114_v5 = vsel %vm1109_vm12, %v1112_v4, %v1108_v3  ;;  %v1118_v6 = vstv %s2264_s23  ;;  %s2266_s1 = spop %2265 }
 0x144   : > { %v1120_v8 = vsel %vm1115_vm13, %v1118_v6, %v1114_v5  ;;  %v1124_v9 = vstv %s2266_s1  ;;  %s2268_s4 = spop %2267 }
 0x145   : > { %v1126_v10 = vsel %vm1121_vm14, %v1124_v9, %v1120_v8  ;;  %v1130_v11 = vstv %s2268_s4  ;;  %s2270_s24 = spop %2269 }
 0x146   : > { %v1132_v12 = vsel %vm1127_vm15, %v1130_v11, %v1126_v10  ;;  %v1136_v13 = vstv %s2270_s24  ;;  %s2272_s22 = spop %2271 }
 0x147   : > { %v1138_v15 = vsel %vm1133_vm0, %v1136_v13, %v1132_v12  ;;  %v1142_v16 = vstv %s2272_s22 }
 0x148   : > { %v1144_v18 = vsel %vm1139_vm3, %v1142_v16, %v1138_v15 }
 0x162   : > { %v1558_v31 = vpop.permute.xlu2 %1557 }
 0x163   : > { %2228 = vmatpush.xpose.msk.msra.mxu3 %vm1042_vm1, %v1558_v31 }
 0x16a   : > { %v1556_v40 = vpop.permute.xlu2 %1555 }
 0x16b   : > { %2229 = vmatpush.xpose.msk.msra.mxu3 %vm1042_vm1, %v1556_v40 }
 0x172   : > { %v1384_v42 = vpop.permute.xlu2 %1383 }
 0x173   : > { %2224 = vmatpush.xpose.msk.msrb.mxu0 %vm1042_vm1, %v1384_v42 }
 0x176   : > { %v3458_v41 = vpop.permute.xlu1 %1207 }
 0x17a   : > { %v3490_v47 = vpop.permute.xlu2 %1250  ;;  %v1210_v24 = vpop.permute.xlu0 %1209 }
 0x17b   : > { %2220 = vmatpush.xpose.msk.msrb.mxu2 %vm1042_vm1, %v1210_v24 }
 0x17e   : > { %v1382_v44 = vpop.permute.xlu1 %1381 }
 0x17f   : > { %2225 = vmatpush.xpose.msk.msrb.mxu0 %vm1042_vm1, %v1382_v44  ;;  %2221 = vmatpush.xpose.msk.msrb.mxu2 %vm1042_vm1, %v3458_v41 }
 0x182   : > { %v3496_v50 = vpop.permute.xlu2 %1268 }
 0x186   : > { %v1245_v0 = vpop.permute.xlu1 %1244 }
 0x187   : > { %v1024_v45 = vpop.f32.mrf.mxu0 }
 0x188   : > { %v1025_v46 = vadd.f32 %v2556_v43, %v1024_v45 }
 0x18a   : > { %1377 = vrot.lane.b32.xlu2 %v1025_v46, %s3058_s0  ;;  %1203 = vrot.lane.b32.xlu1 %v1025_v46, %s3056_s26 }
 0x18b   : > { %2218 = vmatmul.msk.f32.vlgmr.msra.gmra.mxu1 %vm1042_vm1, %v1025_v46 }
 0x192   : > { %1551 = vrot.lane.b32.xlu1 %v1025_v46, %s3055_s13  ;;  %1286 = vrot.lane.b32.xlu2 %v1037_v35, %s3057_s21 }
 0x19a   : > { %1262 = vrot.lane.b32.xlu1 %v1098_v33, %s3057_s21  ;;  %1304 = vrot.lane.b32.xlu2 %v1140_v39, %s3057_s21 }
 0x1a2   : > { %1280 = vrot.lane.b32.xlu1 %v1116_v36, %s3057_s21  ;;  %1424 = vrot.lane.b32.xlu2 %v3415_v28, %s3059_s6 }
 0x1aa   : > { %1298 = vrot.lane.b32.xlu1 %v3455_v38, %s3057_s21  ;;  %1442 = vrot.lane.b32.xlu2 %v1104_v30, %s3059_s6 }
 0x1b2   : > { %1418 = vrot.lane.b32.xlu1 %v3418_v29, %s3059_s6  ;;  %1460 = vrot.lane.b32.xlu2 %v1037_v35, %s3059_s6 }
 0x1ba   : > { %1436 = vrot.lane.b32.xlu1 %v1098_v33, %s3059_s6  ;;  %1478 = vrot.lane.b32.xlu2 %v1140_v39, %s3059_s6 }
 0x1c2   : > { %1454 = vrot.lane.b32.xlu1 %v1116_v36, %s3059_s6  ;;  %1598 = vrot.lane.b32.xlu2 %v3415_v28, %s3060_s10  ;;  %v1239_v28 = vpop.permute.xlu0 %1238 }
 0x1c3   : > { %2273 = vpush %v1239_v28 }
 0x1c4   : > { %2275 = vpush %v1245_v0 }
 0x1c5   : > { %2277 = vpush %v3490_v47 }
 0x1ca   : > { %1472 = vrot.lane.b32.xlu1 %v3455_v38, %s3059_s6  ;;  %1616 = vrot.lane.b32.xlu2 %v1104_v30, %s3060_s10 }
 0x1d2   : > { %1592 = vrot.lane.b32.xlu1 %v3418_v29, %s3060_s10  ;;  %1634 = vrot.lane.b32.xlu2 %v1037_v35, %s3060_s10  ;;  %v1257_v29 = vpop.permute.xlu0 %1256 }
 0x1d3   : > { %2279 = vpush %v1257_v29 }
 0x1da   : > { %1610 = vrot.lane.b32.xlu1 %v1098_v33, %s3060_s10  ;;  %1652 = vrot.lane.b32.xlu2 %v1140_v39, %s3060_s10 }
 0x1e2   : > { %1628 = vrot.lane.b32.xlu1 %v1116_v36, %s3060_s10  ;;  %2542 = vrot.lane.b32.xlu2 %v3586_v48, %s3056_s26 }
 0x1e4   : > { %v1378_v54 = vpop.permute.xlu2 %1377 }
 0x1e5   : > { %2226 = vmatmul.msk.f32.vlgmr.msrb.gmra.mxu0 %vm1042_vm1, %v1378_v54 }
 0x1ea   : > { %1646 = vrot.lane.b32.xlu1 %v3455_v38, %s3060_s10 }
 0x1ec   : > { %v1287_v36 = vpop.permute.xlu2 %1286 }
 0x1f4   : > { %v1305_v41 = vpop.permute.xlu2 %1304  ;;  %s3590_s30 = spop %2273 }
 0x1f5   : > { %s3592_s2 = spop %2275 }
 0x1fc   : > { %v3529_v7 = vpop.permute.xlu1 %1203 }
 0x204   : > { %v1552_v14 = vpop.permute.xlu1 %1551 }
 0x205   : > { %2230 = vmatmul.msk.f32.vlgmr.msra.gmra.mxu3 %vm1042_vm1, %v1552_v14 }
 0x208   : > { %v1069_v17 = vpop.f32.mrf.mxu1 }
 0x209   : > { %v1072_v19 = vmul.f32 0.35355338, %v1069_v17 }
 0x20b   : > { %v1145_v21 = vadd.f32 %v1144_v18, %v1072_v19 }
 0x20c   : > { %v1263_v30 = vpop.permute.xlu1 %1262 }
 0x20d   : > { %v1149_v22 = vadd.f32 %v3551_v20, %v1145_v21  ;;  %2281 = vpush %v1263_v30 }
 0x20e   : > { %2283 = vpush %v3496_v50 }
 0x20f   : > { %v1151_v23 = vsel %vm1150_vm4, %v1149_v22, -inf }
 0x210   : > { %1152 = vmax.xlane.f32.xlu0 %v1151_v23 }
 0x214   : > { %v1281_v33 = vpop.permute.xlu1 %1280 }
 0x21c   : > { %v1299_v39 = vpop.permute.xlu1 %1298 }
 0x224   : > { %1274 = vrot.lane.b32.xlu0 %v3442_v34, %s3057_s21 }
 0x22c   : > { %1292 = vrot.lane.b32.xlu0 %v3452_v37, %s3057_s21  ;;  %s3594_s21 = spop %2277 }
 0x22d   : > { %s3596_s26 = spop %2279 }
 0x234   : > { %1412 = vrot.lane.b32.xlu0 %v3409_v25, %s3059_s6 }
 0x23c   : > { %1430 = vrot.lane.b32.xlu0 %v3438_v32, %s3059_s6 }
 0x244   : > { %1448 = vrot.lane.b32.xlu0 %v3442_v34, %s3059_s6 }
 0x24c   : > { %1466 = vrot.lane.b32.xlu0 %v3452_v37, %s3059_s6  ;;  %s3598_s6 = spop %2281 }
 0x254   : > { %1586 = vrot.lane.b32.xlu0 %v3409_v25, %s3060_s10 }
 0x25c   : > { %1604 = vrot.lane.b32.xlu0 %v3438_v32, %s3060_s10  ;;  %v1419_v32 = vpop.permute.xlu1 %1418 }
 0x262   : > { %v1408_v21 = vpop.f32.mrf.mxu0 }
 0x263   : > { %v1411_v26 = vmul.f32 0.35355338, %v1408_v21 }
 0x264   : > { %1622 = vrot.lane.b32.xlu0 %v3442_v34, %s3060_s10  ;;  %v1425_v34 = vpop.permute.xlu2 %1424  ;;  %v1437_v42 = vpop.permute.xlu1 %1436 }
 0x26c   : > { %1640 = vrot.lane.b32.xlu0 %v3452_v37, %s3060_s10  ;;  %v1443_v43 = vpop.permute.xlu2 %1442  ;;  %v1455_v45 = vpop.permute.xlu1 %1454  ;;  %s3600_s10 = spop %2283 }
 0x274   : > { %v1461_v46 = vpop.permute.xlu2 %1460  ;;  %v1473_v49 = vpop.permute.xlu1 %1472 }
 0x27c   : > { %v1479_v51 = vpop.permute.xlu2 %1478  ;;  %v1593_v54 = vpop.permute.xlu1 %1592 }
 0x283   : > { %v1153_v31 = vpop.xlane.xlu0 %1152 }
 0x284   : > { %v1154_v35 = vsub.f32 %v1149_v22, %v1153_v31  ;;  %v1599_v55 = vpop.permute.xlu2 %1598  ;;  %v1611_v57 = vpop.permute.xlu1 %1610 }
 0x286   : > { %v1155_v38 = vmul.f32 1.442695, %v1154_v35 }
 0x288   : > { %2565 = vpow2.f32 %v1155_v38 }
 0x28c   : > { %v1617_v58 = vpop.permute.xlu2 %1616  ;;  %v1629_v60 = vpop.permute.xlu1 %1628 }
 0x28e   : > { %v3580_v40 = vpop.eup %2565 }
 0x28f   : > { %2219 = vmatmul.msk.f32.vlgmr.msra.gmra.mxu2 %vm1150_vm4, %v3580_v40 }
 0x294   : > { %v1635_v61 = vpop.permute.xlu2 %1634  ;;  %v1647_v4 = vpop.permute.xlu1 %1646 }
 0x296   : > { %v1275_v25 = vpop.permute.xlu0 %1274 }
 0x297   : > { %2222 = vmatmul.msk.f32.vlgmr.msrb.gmra.mxu2 %vm1042_vm1, %v3529_v7  ;;  %2285 = vpush %v1275_v25 }
 0x298   : > { %2287 = vpush %v1281_v33 }
 0x299   : > { %2289 = vpush %v1287_v36 }
 0x29c   : > { %v1653_v6 = vpop.permute.xlu2 %1652 }
 0x29e   : > { %v1293_v37 = vpop.permute.xlu0 %1292 }
 0x29f   : > { %2291 = vpush %v1293_v37 }
 0x2a0   : > { %2293 = vpush %v1299_v39  ;;  %v1241_v39 = vstv %s3590_s30 }
 0x2a1   : > { %2295 = vpush %v1305_v41 }
 0x2a4   : > { %v2543_v21 = vpop.permute.xlu2 %2542 }
 0x2a6   : > { %v1413_v44 = vpop.permute.xlu0 %1412 }
 0x2a7   : > { %2297 = vpush %v1413_v44  ;;  %v1253_v44 = vstv %s3594_s21 }
 0x2a8   : > { %2299 = vpush %v1419_v32  ;;  %v1243_v32 = vsel %vm1073_vm6, %v1241_v39, 0.0 }
 0x2a9   : > { %2301 = vpush %v1425_v34  ;;  %v1247_v34 = vstv %s3592_s2 }
 0x2ae   : > { %v1431_v47 = vpop.permute.xlu0 %1430 }
 0x2af   : > { %2303 = vpush %v1431_v47 }
 0x2b0   : > { %2305 = vpush %v1437_v42 }
 0x2b1   : > { %2307 = vpush %v1443_v43  ;;  %v1249_v43 = vsel %vm1079_vm7, %v1247_v34, %v1243_v32 }
 0x2b6   : > { %v1449_v50 = vpop.permute.xlu0 %1448 }
 0x2b7   : > { %2309 = vpush %v1449_v50  ;;  %v1255_v50 = vsel %vm1085_vm8, %v1253_v44, %v1249_v43 }
 0x2b8   : > { %2311 = vpush %v1455_v45 }
 0x2b9   : > { %2313 = vpush %v1461_v46 }
 0x2be   : > { %v1467_v52 = vpop.permute.xlu0 %1466 }
 0x2bf   : > { %2315 = vpush %v1467_v52 }
 0x2c0   : > { %2317 = vpush %v1473_v49 }
 0x2c1   : > { %2319 = vpush %v1479_v51  ;;  %v1259_v51 = vstv %s3596_s26 }
 0x2c6   : > { %v1587_v56 = vpop.permute.xlu0 %1586 }
 0x2c7   : > { %2321 = vpush %v1587_v56 }
 0x2c8   : > { %2323 = vpush %v1593_v54  ;;  %s3602_s20 = spop %2285  ;;  %v1261_v54 = vsel %vm1091_vm9, %v1259_v51, %v1255_v50 }
 0x2c9   : > { %2325 = vpush %v1599_v55  ;;  %s3604_s17 = spop %2287  ;;  %v1265_v55 = vstv %s3598_s6 }
 0x2ca   : > { %s3606_s29 = spop %2289 }
 0x2ce   : > { %v1605_v59 = vpop.permute.xlu0 %1604 }
 0x2cf   : > { %2327 = vpush %v1605_v59  ;;  %v1267_v59 = vsel %vm1097_vm10, %v1265_v55, %v1261_v54  ;;  %v1157_v55 = vsel %vm1150_vm4, %v3580_v40, 0.0 }
 0x2d0   : > { %2329 = vpush %v1611_v57  ;;  %s3608_s23 = spop %2291 }
 0x2d1   : > { %2331 = vpush %v1617_v58  ;;  %s3610_s1 = spop %2293 }
 0x2d2   : > { %s3612_s4 = spop %2295 }
 0x2d6   : > { %v1623_v62 = vpop.permute.xlu0 %1622 }
 0x2d7   : > { %2333 = vpush %v1623_v62 }
 0x2d8   : > { %2335 = vpush %v1629_v60  ;;  %s2298_s24 = spop %2297  ;;  %v1271_v60 = vstv %s3600_s10 }
 0x2d9   : > { %2337 = vpush %v1635_v61  ;;  %v1415_v63 = vstv %s2298_s24  ;;  %s2300_s22 = spop %2299  ;;  %v1277_v61 = vstv %s3602_s20  ;;  %s3063_s20 = smov 24  }
 0x2da   : > { %v1417_v0 = vsel %vm1073_vm6, %v1415_v63, 0.0  ;;  %v1421_v1 = vstv %s2300_s22  ;;  %s2302_s14 = spop %2301 }
 0x2db   : > { %v1423_v2 = vsel %vm1079_vm7, %v1421_v1, %v1417_v0  ;;  %v1427_v3 = vstv %s2302_s14  ;;  %v1273_v0 = vsel %vm1103_vm11, %v1271_v60, %v1267_v59 }
 0x2dc   : > { %v1429_v7 = vsel %vm1085_vm8, %v1427_v3, %v1423_v2  ;;  %v1279_v1 = vsel %vm1109_vm12, %v1277_v61, %v1273_v0  ;;  %v1283_v2 = vstv %s3604_s17  ;;  %s2236_s17 = sshll.u32 %s3028_s3, 1 }
 0x2de   : > { %v1641_v5 = vpop.permute.xlu0 %1640 }
 0x2df   : > { %2339 = vpush %v1641_v5 }
 0x2e0   : > { %2341 = vpush %v1647_v4  ;;  %s2304_s11 = spop %2303  ;;  %v1582_v4 = vpop.f32.mrf.mxu3 }
 0x2e1   : > { %2343 = vpush %v1653_v6  ;;  %v1433_v8 = vstv %s2304_s11  ;;  %s2306_s12 = spop %2305  ;;  %v1285_v6 = vsel %vm1115_vm13, %v1283_v2, %v1279_v1 }
 0x2e2   : > { %v1435_v9 = vsel %vm1091_vm9, %v1433_v8, %v1429_v7  ;;  %v1439_v10 = vstv %s2306_s12  ;;  %s2308_s24 = spop %2307  ;;  %v1289_v7 = vstv %s3606_s29  ;;  %s3923_s29 = sld [smem:[#allocation54_spill]] }
 0x2e3   : > { %v1441_v11 = vsel %vm1097_vm10, %v1439_v10, %v1435_v9  ;;  %v1445_v12 = vstv %s2308_s24 }
 0x2e4   : > { %v1447_v13 = vsel %vm1103_vm11, %v1445_v12, %v1441_v11  ;;  %v1585_v11 = vmul.f32 0.35355338, %v1582_v4  ;;  %v1295_v12 = vstv %s3608_s23 }
 0x2e8   : > { %s2310_s22 = spop %2309  ;;  %s3924_s23 = smov %s3923_s29 }
 0x2e9   : > { %v1451_v14 = vstv %s2310_s22  ;;  %s2312_s14 = spop %2311 }
 0x2ea   : > { %v1453_v15 = vsel %vm1109_vm12, %v1451_v14, %v1447_v13  ;;  %v1457_v16 = vstv %s2312_s14  ;;  %s2314_s11 = spop %2313 }
 0x2eb   : > { %v1459_v17 = vsel %vm1115_vm13, %v1457_v16, %v1453_v15  ;;  %v1463_v18 = vstv %s2314_s11  ;;  %v1291_v16 = vsel %vm1121_vm14, %v1289_v7, %v1285_v6 }
 0x2ec   : > { %v1465_v19 = vsel %vm1121_vm14, %v1463_v18, %v1459_v17  ;;  %v1297_v18 = vsel %vm1127_vm15, %v1295_v12, %v1291_v16 }
 0x2f0   : > { %s2316_s12 = spop %2315 }
 0x2f1   : > { %v1469_v22 = vstv %s2316_s12  ;;  %s2318_s24 = spop %2317 }
 0x2f2   : > { %v1471_v23 = vsel %vm1127_vm15, %v1469_v22, %v1465_v19  ;;  %v1475_v24 = vstv %s2318_s24  ;;  %s2320_s22 = spop %2319  ;;  %v1301_v19 = vstv %s3610_s1 }
 0x2f3   : > { %v1477_v27 = vsel %vm1133_vm0, %v1475_v24, %v1471_v23  ;;  %v1481_v28 = vstv %s2320_s22  ;;  %v2545_v23 = vunpack.i.h.bf16 %v2543_v21  ;;  %v2544_v24 = vunpack.i.l.bf16 %v2543_v21 }
 0x2f4   : > { %v1483_v29 = vsel %vm1139_vm3, %v1481_v28, %v1477_v27  ;;  %v1307_v27 = vstv %s3612_s4 }
 0x2f5   : > { %v1484_v30 = vadd.f32 %v1483_v29, %v1411_v26  ;;  %v1303_v26 = vsel %vm1133_vm0, %v1301_v19, %v1297_v18  ;;  %1346 = vmatpush.msra.mxu2 %v2544_v24 }
 0x2f7   : > { %v3639_v31 = vadd.f32 %v3551_v20, %v1484_v30  ;;  %1347 = vmatpush.msra.mxu2 %v2545_v23 }
 0x2f8   : > { %s2322_s14 = spop %2321 }
 0x2f9   : > { %v1486_v33 = vsel %vm1150_vm4, %v3639_v31, -inf  ;;  %v1589_v35 = vstv %s2322_s14  ;;  %s2324_s11 = spop %2323 }
 0x2fa   : > { %1487 = vmax.xlane.f32.xlu2 %v1486_v33  ;;  %v1591_v36 = vsel %vm1073_vm6, %v1589_v35, 0.0  ;;  %v1595_v38 = vstv %s2324_s11  ;;  %s2326_s12 = spop %2325  ;;  %v1309_v33 = vsel %vm1139_vm3, %v1307_v27, %v1303_v26 }
 0x2fb   : > { %v1597_v41 = vsel %vm1079_vm7, %v1595_v38, %v1591_v36  ;;  %v1601_v25 = vstv %s2326_s12  ;;  %s3926_s12 = sld [smem:[#allocation57_spill]] }
 0x2fc   : > { %v1603_v37 = vsel %vm1085_vm8, %v1601_v25, %v1597_v41 }
 0x300   : > { %s2328_s24 = spop %2327 }
 0x301   : > { %v1607_v42 = vstv %s2328_s24  ;;  %s2330_s22 = spop %2329 }
 0x302   : > { %v1609_v45 = vsel %vm1091_vm9, %v1607_v42, %v1603_v37  ;;  %v1613_v46 = vstv %s2330_s22  ;;  %s2332_s30 = spop %2331 }
 0x303   : > { %v1615_v47 = vsel %vm1097_vm10, %v1613_v46, %v1609_v45  ;;  %v1619_v49 = vstv %s2332_s30 }
 0x304   : > { %v1621_v52 = vsel %vm1103_vm11, %v1619_v49, %v1615_v47 }
 0x308   : > { %s2334_s2 = spop %2333 }
 0x309   : > { %v1625_v56 = vstv %s2334_s2  ;;  %s2336_s21 = spop %2335  ;;  %s1949_s2 = sshll.u32 %s890_s28, 4  ;;  %s1950_s2 = int_to_ptr.vmem [resolvable:$true] %s1949_s2 }
 0x30a   : > { %v1627_v57 = vsel %vm1109_vm12, %v1625_v56, %v1621_v52  ;;  %v1631_v58 = vstv %s2336_s21  ;;  %s2338_s14 = spop %2337 }
 0x30b   : > { %v1633_v62 = vsel %vm1115_vm13, %v1631_v58, %v1627_v57  ;;  %v1637_v63 = vstv %s2338_s14  ;;  %s3929_s14 = sand.u32 1, %s3016_s25  }
 0x30c   : > { %v1639_v3 = vsel %vm1121_vm14, %v1637_v63, %v1633_v62 }
 0x310   : > { %s2340_s26 = spop %2339 }
 0x311   : > { %v1643_v5 = vstv %s2340_s26  ;;  %s2342_s6 = spop %2341  ;;  %s1935_s26 = scalar_lea.sflag [#allocation7], %s3929_s14 }
 0x312   : > { %v1645_v8 = vsel %vm1127_vm15, %v1643_v5, %v1639_v3  ;;  %v1649_v9 = vstv %s2342_s6  ;;  %v3688_v10 = vpop.f32.mrf.mxu2  ;;  %s2344_s10 = spop %2343 }
 0x313   : > { %v1651_v13 = vsel %vm1133_vm0, %v1649_v9, %v1645_v8  ;;  %v1655_v14 = vstv %s2344_s10 }
 0x314   : > { %v1657_v15 = vsel %vm1139_vm3, %v1655_v14, %v1651_v13 }
 0x315   : > { %v1658_v17 = vadd.f32 %v1657_v15, %v1585_v11 }
 0x317   : > { %v1659_v22 = vadd.f32 %v3551_v20, %v1658_v17 }
 0x319   : > { %v1660_v28 = vsel %vm1150_vm4, %v1659_v22, -inf }
 0x31a   : > { %v1234_v29 = vpop.f32.mrf.mxu2  ;;  %1661 = vmax.xlane.f32.xlu1 %v1660_v28 }
 0x31b   : > { %v1237_v30 = vmul.f32 0.35355338, %v1234_v29 }
 0x31d   : > { %v1310_v35 = vadd.f32 %v1309_v33, %v1237_v30 }
 0x31f   : > { %v1311_v36 = vadd.f32 %v3551_v20, %v1310_v35 }
 0x321   : > { %v1312_v38 = vsel %vm1150_vm4, %v1311_v36, -inf }
 0x322   : > { %1313 = vmax.xlane.f32.xlu0 %v1312_v38 }
 0x333   : > { %2552 = vrot.lane.b32.xlu1 %v3586_v48, %s3058_s0  ;;  %s3062_s0 = smov 16  }
 0x336   : > { %2547 = vrot.lane.b32.xlu0 %v3586_v48, %s3055_s13  ;;  %s3061_s13 = smov 8  }
 0x36d   : > { %v1488_v32 = vpop.xlane.xlu2 %1487 }
 0x36e   : > { %v1489_v42 = vsub.f32 %v3639_v31, %v1488_v32 }
 0x370   : > { %v1490_v44 = vmul.f32 1.442695, %v1489_v42 }
 0x38d   : > { %v1662_v39 = vpop.xlane.xlu1 %1661 }
 0x38e   : > { %v1663_v41 = vsub.f32 %v1659_v22, %v1662_v39 }
 0x390   : > { %v1664_v25 = vmul.f32 1.442695, %v1663_v41 }
 0x392   : > { %2567 = vpow2.f32 %v1664_v25 }
 0x395   : > { %v1314_v34 = vpop.xlane.xlu0 %1313 }
 0x396   : > { %v1315_v53 = vsub.f32 %v1311_v36, %v1314_v34 }
 0x398   : > { %v2568_v37 = vpop.eup %2567  ;;  %v1316_v20 = vmul.f32 1.442695, %v1315_v53 }
 0x399   : > { %v1666_v43 = vsel %vm1150_vm4, %v2568_v37, 0.0 }
 0x39a   : > { %2569 = vpow2.f32 %v1316_v20  ;;  %1667 = vadd.xlane.f32.xlu0 %v1666_v43 }
 0x39b   : > { %2571 = vpow2.f32 %v1490_v44 }
 0x3a0   : > { %v2570_v45 = vpop.eup %2569 }
 0x3a1   : > { %2223 = vmatmul.msk.f32.vlgmr.msra.gmra.mxu2 %vm1150_vm4, %v2570_v45  ;;  %v1318_v48 = vsel %vm1150_vm4, %v2570_v45, 0.0  ;;  %v2572_v47 = vpop.eup %2571  ;;  %v1725_v45 = vld [vmem:[#allocation13 + $0x18] sm:$0xff] }
 0x3a2   : > { %1319 = vadd.xlane.f32.xlu2 %v1318_v48  ;;  %v1492_v52 = vsel %vm1150_vm4, %v2572_v47, 0.0  ;;  %v1724_v48 = vld [vmem:[#allocation13 + $0x10] sm:$0xff]  ;;  %1745 = vmatpush.msra.mxu0 %v1725_v45  ;;  %v1865_v45 = vld [vmem:[%s3924_s23 + $0x8] sm:$0xff] }
 0x3a4   : > { %1746 = vmatpush.msra.mxu0 %v1724_v48  ;;  %v1864_v48 = vld [vmem:[%s3924_s23] sm:$0xff] }
 0x3a5   : > { %v2553_v46 = vpop.permute.xlu1 %2552 }
 0x3a6   : > { %v2554_v49 = vunpack.i.l.bf16 %v2553_v46  ;;  %v2555_v50 = vunpack.i.h.bf16 %v2553_v46  ;;  %v1723_v46 = vld [vmem:[#allocation13 + $0x8] sm:$0xff] }
 0x3a7   : > { %1747 = vmatpush.msra.mxu0 %v1723_v46 }
 0x3a8   : > { %1520 = vmatpush.msrb.mxu1 %v2554_v49  ;;  %v2548_v51 = vpop.permute.xlu0 %2547 }
 0x3a9   : > { %v2549_v31 = vunpack.i.l.bf16 %v2548_v51  ;;  %v2550_v54 = vunpack.i.h.bf16 %v2548_v51 }
 0x3aa   : > { %1521 = vmatpush.msrb.mxu1 %v2555_v50  ;;  %1493 = vadd.xlane.f32.xlu2 %v1492_v52 }
 0x3ab   : > { %2227 = vmatmul.msk.f32.vlgmr.msrb.gmra.mxu1 %vm1150_vm4, %v2572_v47  ;;  %1694 = vmatpush.msrb.mxu2 %v2549_v31  ;;  %v1722_v47 = vld [vmem:[#allocation13] sm:$0xff] }
 0x3ac   : > { %1748 = vmatpush.msra.mxu0 %v1722_v47  ;;  %v2558_v31 = vld [vmem:[#allocation14] ss:$0 sm:$0xff] }
 0x3ad   : > { %1695 = vmatpush.msrb.mxu2 %v2550_v54 }
 0x3ae   : > { %2231 = vmatmul.msk.f32.vlgmr.msrb.gmra.mxu2 %vm1150_vm4, %v2568_v37 }
 0x3b2   : > { %1158 = vadd.xlane.f32.xlu2 %v1157_v55  ;;  %v2591_v55 = vld [vmem:[%s3383_s7] sm:$0xff]  ;;  %s3925_s7 = sld [smem:[#allocation55_spill]] }
 0x40d   : > { %v1668_v56 = vpop.xlane.xlu0 %1667 }
 0x40e   : > { %2573 = vrcp.f32 %v1668_v56  ;;  %v1711_v21 = vand.u32 2147483648, %v1668_v56  ;;  %vm1705_vm13 = vweird.f32 %v1668_v56  ;;  %v1709_v24 = vand.u32 2147483647, %v1668_v56 }
 0x410   : > { %v1712_v38 = vor.u32 1.1754944e-38, %v1711_v21  ;;  %vm1710_vm0 = vcmp.eq.f32.partialorder %v1709_v24, 8.507059e+37 }
 0x414   : > { %v3722_v58 = vpop.eup %2573 }
 0x415   : > { %v1320_v57 = vpop.xlane.xlu2 %1319  ;;  %v1701_v62 = vmul.f32 %v3722_v58, %v1668_v56  ;;  %vm1706_vm10 = vweird.f32 %v3722_v58 }
 0x416   : > { %2575 = vrcp.f32 %v1320_v57  ;;  %v1363_v0 = vand.u32 2147483648, %v1320_v57  ;;  %v1361_v2 = vand.u32 2147483647, %v1320_v57  ;;  %vm1357_vm6 = vweird.f32 %v1320_v57  ;;  %vm3728_vm15 = vmor %vm1705_vm13, %vm1706_vm10 }
 0x417   : > { %v1702_v3 = vsub.f32 1.0, %v1701_v62 }
 0x418   : > { %v1364_v5 = vor.u32 1.1754944e-38, %v1363_v0  ;;  %vm1362_vm8 = vcmp.eq.f32.partialorder %v1361_v2, 8.507059e+37 }
 0x419   : > { %v1703_v12 = vmul.f32 %v3722_v58, %v1702_v3 }
 0x41b   : > { %v1704_v18 = vadd.f32 %v3722_v58, %v1703_v12 }
 0x41c   : > { %v2576_v59 = vpop.eup %2575 }
 0x41d   : > { %v1353_v60 = vmul.f32 %v2576_v59, %v1320_v57  ;;  %v1494_v61 = vpop.xlane.xlu2 %1493  ;;  %vm1358_vm5 = vweird.f32 %v2576_v59  ;;  %v1708_v33 = vsel %vm3728_vm15, %v3722_v58, %v1704_v18  ;;  %v3064_v58 = vmov 32.0  }
 0x41e   : > { %2577 = vrcp.f32 %v1494_v61  ;;  %vm1359_vm7 = vmor %vm1357_vm6, %vm1358_vm5  ;;  %v1537_v15 = vand.u32 2147483648, %v1494_v61  ;;  %v1535_v17 = vand.u32 2147483647, %v1494_v61  ;;  %vm1531_vm11 = vweird.f32 %v1494_v61 }
 0x41f   : > { %v1354_v63 = vsub.f32 1.0, %v1353_v60  ;;  %v1713_v34 = vsel %vm1710_vm0, %v1712_v38, %v1708_v33  ;;  %v1871_v38 = vld [vmem:[%s3923_s29 + $0x38] sm:$0xff]  ;;  %s1945_s29 = sadd.s32 %s3024_s27, %s2236_s17  ;;  %s3928_s27 = sld [smem:[#allocation56_spill]] }
 0x420   : > { %v1538_v23 = vor.u32 1.1754944e-38, %v1537_v15  ;;  %vm1536_vm14 = vcmp.eq.f32.partialorder %v1535_v17, 8.507059e+37  ;;  %1888 = vmatpush.msrb.mxu3 %v1871_v38  ;;  %s2237_s1 = sshll.u32 %s1945_s29, 3 }
 0x421   : > { %v1355_v1 = vmul.f32 %v2576_v59, %v1354_v63  ;;  %s1947_s24 = scalar_lea.hbm %s3926_s12, %s2237_s1 }
 0x422   : > { %s1951_s21 = sshll.u32 %s1947_s24, 4  ;;  %s1952_s21 = int_to_ptr.hbm [resolvable:$true] %s1951_s21 }
 0x423   : > { %v1356_v40 = vadd.f32 %v2576_v59, %v1355_v1  ;;  %s2936_s6 = sshra.s32 %s1952_s21, 4  ;;  %s2937_s6 = int_to_ptr.hbm [resolvable:$true] %s2936_s6 }
 0x424   : > { %v2578_v4 = vpop.eup %2577  ;;  %v1349_v9 = vpop.f32.mrf.mxu2  ;;  %s2938_s10 = scalar_lea.hbm %s2937_s6, 8  ;;  %p2943_p9 = scmp.lt.s32.totalorder %s2937_s6, %s3926_s12 }
 0x425   : > { %v1527_v6 = vmul.f32 %v2578_v4, %v1494_v61  ;;  %v1360_v7 = vsel %vm1359_vm7, %v2576_v59, %v1356_v40  ;;  %v1159_v8 = vpop.xlane.xlu2 %1158  ;;  %vm1532_vm9 = vweird.f32 %v2578_v4  ;;  %vm1371_vm7 = vcmask 130112   ;;  %p2939_p5 = scmp.ne.s32.totalorder %s2937_s6, %s2938_s10 }
 0x426   : > { %v1365_v11 = vsel %vm1362_vm8, %v1364_v5, %v1360_v7  ;;  %2579 = vrcp.f32 %v1159_v8  ;;  %vm1533_vm12 = vmor %vm1531_vm11, %vm1532_vm9  ;;  %v1194_v39 = vand.u32 2147483648, %v1159_v8  ;;  %v1192_v25 = vand.u32 2147483647, %v1159_v8  ;;  %v1796_v5 = vld [vmem:[#allocation19 + $0x18] sm:$0xff]  ;;  %v1794_v7 = vld [vmem:[#allocation19 + $0x8] sm:$0xff] }
 0x427   : > { %v1528_v13 = vsub.f32 1.0, %v1527_v6  ;;  %v1366_v14 = vmul.f32 %v1365_v11, %v1349_v9  ;;  %vm1188_vm4 = vweird.f32 %v1159_v8  ;;  %vm1545_vm8 = vcmask 195712   ;;  %1816 = vmatpush.msra.mxu1 %v1796_v5  ;;  %v1795_v6 = vld [vmem:[#allocation19 + $0x10] sm:$0xff]  ;;  %p2940_p6 = pnand %p2939_p5, %p3227_p3 }
 0x428   : > { %v1523_v29 = vpop.f32.mrf.mxu1  ;;  %v1195_v42 = vor.u32 1.1754944e-38, %v1194_v39  ;;  %vm1193_vm6 = vcmp.eq.f32.partialorder %v1192_v25, 8.507059e+37  ;;  %vm1719_vm9 = vcmask 261312   ;;  %2581 = vrcp.f32 %v3064_v58  ;;  %v1870_v39 = vld [vmem:[%s3924_s23 + $0x30] sm:$0xff]  ;;  %v1868_v25 = vld [vmem:[%s3924_s23 + $0x20] sm:$0xff] }
 0x429   : > { %v1529_v16 = vmul.f32 %v2578_v4, %v1528_v13  ;;  %1368 = vrot.lane.b32.xlu1 %v1366_v14, %s3061_s13  ;;  %1817 = vmatpush.msra.mxu1 %v1795_v6  ;;  %v2562_v6 = vld [vmem:[%s3925_s7] ss:$0 sm:$0xff]  ;;  %p2941_p7 = pneg %p2940_p6 }
 0x42a   : > { %1889 = vmatpush.msrb.mxu3 %v1870_v39 }
 0x42b   : > { %v1530_v19 = vadd.f32 %v2578_v4, %v1529_v16  ;;  %1818 = vmatpush.msra.mxu1 %v1794_v7 }
 0x42c   : > { %v2580_v22 = vpop.eup %2579 }
 0x42d   : > { %v1184_v26 = vmul.f32 %v2580_v22, %v1159_v8  ;;  %v1534_v27 = vsel %vm1533_vm12, %v2578_v4, %v1530_v19  ;;  %vm1189_vm3 = vweird.f32 %v2580_v22  ;;  %v1793_v8 = vld [vmem:[#allocation19] sm:$0xff]  ;;  %v2559_v19 = vld [vmem:[#allocation16] ss:$0 sm:$0xff] }
 0x42e   : > { %v1539_v30 = vsel %vm1536_vm14, %v1538_v23, %v1534_v27  ;;  %vm1190_vm5 = vmor %vm1188_vm4, %vm1189_vm3  ;;  %v2582_v59 = vpop.eup %2581  ;;  %1819 = vmatpush.msra.mxu1 %v1793_v8  ;;  %v2560_v23 = vld [vmem:[#allocation17] ss:$0 sm:$0xff]  ;;  %v2561_v27 = vld [vmem:[#allocation20] ss:$0 sm:$0xff]  ;;  %vm1876_vm4 = vcmask 523264  }
 0x42f   : > { %v1185_v35 = vsub.f32 1.0, %v1184_v26  ;;  %v1540_v36 = vmul.f32 %v1539_v30, %v1523_v29  ;;  %v1758_v60 = vmul.f32 32.0, %v2582_v59 }
 0x431   : > { %v1186_v41 = vmul.f32 %v2580_v22, %v1185_v35  ;;  %1542 = vrot.lane.b32.xlu2 %v1540_v36, %s3062_s0  ;;  %v1697_v32 = vpop.f32.mrf.mxu2  ;;  %v1759_v61 = vsub.f32 1.0, %v1758_v60 }
 0x432   : > { %v1714_v53 = vmul.f32 %v1713_v34, %v1697_v32 }
 0x433   : > { %v1187_v37 = vadd.f32 %v2580_v22, %v1186_v41  ;;  %v1760_v62 = vmul.f32 %v2582_v59, %v1759_v61  ;;  %v1869_v41 = vld [vmem:[%s3924_s23 + $0x28] sm:$0xff] }
 0x434   : > { %1716 = vrot.lane.b32.xlu1 %v1714_v53, %s3063_s20  ;;  %1890 = vmatpush.msrb.mxu3 %v1869_v41  ;;  %v1867_v53 = vld [vmem:[%s3924_s23 + $0x18] sm:$0xff]  ;;  %s2942_s20 = scalar_lea.hbm %s3926_s12, 32 }
 0x435   : > { %v1191_v20 = vsel %vm1190_vm5, %v2580_v22, %v1187_v37  ;;  %v1761_v63 = vadd.f32 %v2582_v59, %v1760_v62  ;;  %p2944_p10 = scmp.lt.s32.totalorder %s2942_s20, %s2938_s10 }
 0x436   : > { %v1196_v43 = vsel %vm1193_vm6, %v1195_v42, %v1191_v20  ;;  %1891 = vmatpush.msrb.mxu3 %v1868_v25  ;;  %v1866_v42 = vld [vmem:[%s3924_s23 + $0x10] sm:$0xff] }
 0x437   : > { %v1197_v44 = vmul.f32 %v1196_v43, %v3688_v10  ;;  %p2945_p11 = por %p2944_p10, %p2943_p9 }
 0x438   : > { %1892 = vmatpush.msrb.mxu3 %v1867_v53 }
 0x439   : > { %1198 = vst.msk [vmem:[#allocation4] sm:$0xff] %vm1042_vm1, %v1197_v44  ;;  %vm1762_vm1 = vweird.f32 %v2582_v59  ;;  %p2946_p12 = pnand %p2945_p11, %p2941_p7 }
 0x43a   : > { %v3740_v0 = vsel %vm1762_vm1, %v2582_v59, %v1761_v63  ;;  %1893 = vmatpush.msrb.mxu3 %v1866_v42 }
 0x43c   : > { %1894 = vmatpush.msrb.mxu3 %v1865_v45 }
 0x43e   : > { %1895 = vmatpush.msrb.mxu3 %v1864_v48 }
 0x48b   : > { %v1543_v50 = vpop.permute.xlu2 %1542 }
 0x49b   : > { %v1369_v49 = vpop.permute.xlu1 %1368 }
 0x49c   : > { %1372 = vst.msk [vmem:[#allocation4] sm:$0xff] %vm1371_vm7, %v1369_v49 }
 0x49d   : > { %1546 = vst.msk [vmem:[#allocation4] sm:$0xff] %vm1545_vm8, %v1543_v50 }
 0x4a6   : > { %v1717_v51 = vpop.permute.xlu1 %1716 }
 0x4a7   : > { %1720 = vst.msk [vmem:[#allocation4] sm:$0xff] %vm1719_vm9, %v1717_v51 }
 0x4ae   : > { %v1721_v10 = vld [vmem:[#allocation4] sm:$0xff] }
 0x4af   : > { %2232 = vmatmul.msk.f32.vlgmr.msra.gmra.mxu0 %vm1003_vm2, %v1721_v10 }
 0x52c   : > { %v1750_v52 = vpop.f32.mrf.mxu0 }
 0x52d   : > { %v1751_v54 = vadd.f32 %v2558_v31, %v1750_v52 }
 0x52f   : > { %v1753_v56 = vadd.f32 %v2591_v55, %v1751_v54 }
 0x531   : > { %v1754_v57 = vsel %vm1003_vm2, %v1753_v56, 0.0 }
 0x532   : > { %1755 = vadd.xlane.f32.xlu1 %v1754_v57 }
 0x5a5   : > { %v1756_v1 = vpop.xlane.xlu1 %1755 }
 0x5a6   : > { %v1764_v2 = vmul.f32 %v3740_v0, %v1756_v1 }
 0x5a8   : > { %v1765_v3 = vsub.f32 %v1753_v56, %v1764_v2 }
 0x5aa   : > { %v1766_v40 = vmul.f32 %v1765_v3, %v1765_v3 }
 0x5ac   : > { %v1767_v4 = vsel %vm1003_vm2, %v1766_v40, 0.0 }
 0x5ad   : > { %1768 = vadd.xlane.f32.xlu2 %v1767_v4 }
 0x620   : > { %v1769_v9 = vpop.xlane.xlu2 %1768 }
 0x621   : > { %v1770_v11 = vmul.f32 %v1769_v9, %v3740_v0 }
 0x623   : > { %v1771_v12 = vadd.f32 1e-06, %v1770_v11 }
 0x625   : > { %2583 = vrsqrt.f32 %v1771_v12  ;;  %vm1778_vm11 = vweird.f32 %v1771_v12 }
 0x62b   : > { %v2584_v13 = vpop.eup %2583 }
 0x62c   : > { %v1773_v14 = vmul.f32 %v2584_v13, %v1771_v12  ;;  %vm1779_vm10 = vweird.f32 %v2584_v13 }
 0x62d   : > { %vm1780_vm12 = vmor %vm1778_vm11, %vm1779_vm10 }
 0x62e   : > { %v1774_v15 = vmul.f32 %v2584_v13, %v1773_v14 }
 0x630   : > { %v1775_v16 = vmul.f32 0.5, %v1774_v15 }
 0x632   : > { %v1776_v17 = vsub.f32 1.5, %v1775_v16 }
 0x634   : > { %v1777_v18 = vmul.f32 %v2584_v13, %v1776_v17 }
 0x636   : > { %v1781_v21 = vsel %vm1780_vm12, %v2584_v13, %v1777_v18 }
 0x637   : > { %v1782_v22 = vmul.f32 %v1781_v21, %v1765_v3 }
 0x639   : > { %v1787_v24 = vmul.f32 %v2559_v19, %v1782_v22 }
 0x63b   : > { %v3745_v26 = vadd.f32 %v2560_v23, %v1787_v24 }
 0x63d   : > { %2233 = vmatmul.msk.f32.vlgmr.msra.gmra.mxu1 %vm1003_vm2, %v3745_v26 }
 0x6ba   : > { %v1821_v28 = vpop.f32.mrf.mxu1 }
 0x6bb   : > { %v1822_v29 = vadd.f32 %v2561_v27, %v1821_v28  ;;  %v2563_v28 = vld [vmem:[#allocation22] ss:$0 sm:$0xff] }
 0x6bd   : > { %v1825_v30 = vmul.f32 0.70710677, %v1822_v29  ;;  %v1824_v40 = vmul.f32 0.5, %v1822_v29 }
 0x6bf   : > { %v1826_v33 = vand.u32 2147483647, %v1825_v30  ;;  %vm1859_vm3 = vcmp.lt.f32.partialorder %v1825_v30, 0.0  ;;  %v2564_v30 = vld [vmem:[%s3928_s27] ss:$0 sm:$0xff] }
 0x6c1   : > { %v1827_v35 = vmul.f32 0.3275911, %v1826_v33  ;;  %v1853_v51 = vsub.f32 0.0, %v1826_v33 }
 0x6c3   : > { %v1828_v36 = vadd.f32 1.0, %v1827_v35  ;;  %v1854_v52 = vmul.f32 %v1853_v51, %v1826_v33 }
 0x6c5   : > { %2585 = vrcp.f32 %v1828_v36  ;;  %v1840_v20 = vand.u32 2147483648, %v1828_v36  ;;  %v1838_v44 = vand.u32 2147483647, %v1828_v36  ;;  %vm1834_vm14 = vweird.f32 %v1828_v36 }
 0x6c6   : > { %v1855_v56 = vmul.f32 1.442695, %v1854_v52 }
 0x6c7   : > { %v1841_v47 = vor.u32 1.1754944e-38, %v1840_v20  ;;  %vm1839_vm0 = vcmp.eq.f32.partialorder %v1838_v44, 8.507059e+37 }
 0x6c8   : > { %2587 = vpow2.f32 %v1855_v56 }
 0x6cb   : > { %v2586_v32 = vpop.eup %2585 }
 0x6cc   : > { %v1830_v34 = vmul.f32 %v2586_v32, %v1828_v36  ;;  %vm1835_vm13 = vweird.f32 %v2586_v32 }
 0x6cd   : > { %vm1836_vm15 = vmor %vm1834_vm14, %vm1835_vm13 }
 0x6ce   : > { %v1831_v37 = vsub.f32 1.0, %v1830_v34  ;;  %v2588_v62 = vpop.eup %2587 }
 0x6d0   : > { %v1832_v43 = vmul.f32 %v2586_v32, %v1831_v37 }
 0x6d2   : > { %v1833_v46 = vadd.f32 %v2586_v32, %v1832_v43 }
 0x6d4   : > { %v1837_v49 = vsel %vm1836_vm15, %v2586_v32, %v1833_v46 }
 0x6d5   : > { %v1842_v50 = vsel %vm1839_vm0, %v1841_v47, %v1837_v49 }
 0x6d6   : > { %v1844_v10 = vmul.f32 1.0614054, %v1842_v50 }
 0x6d8   : > { %v1845_v31 = vadd.f32 -1.4531521, %v1844_v10 }
 0x6da   : > { %v1846_v54 = vmul.f32 %v1845_v31, %v1842_v50 }
 0x6dc   : > { %v1847_v55 = vadd.f32 1.4214138, %v1846_v54 }
 0x6de   : > { %v1848_v57 = vmul.f32 %v1847_v55, %v1842_v50 }
 0x6e0   : > { %v1849_v58 = vadd.f32 -0.28449672, %v1848_v57 }
 0x6e2   : > { %v1850_v59 = vmul.f32 %v1849_v58, %v1842_v50 }
 0x6e4   : > { %v1851_v60 = vadd.f32 0.2548296, %v1850_v59 }
 0x6e6   : > { %v1852_v61 = vmul.f32 %v1851_v60, %v1842_v50 }
 0x6e8   : > { %v1857_v63 = vmul.f32 %v2588_v62, %v1852_v61 }
 0x6ea   : > { %v1858_v1 = vsub.f32 1.0, %v1857_v63 }
 0x6ec   : > { %v1860_v2 = vsub.f32 0.0, %v1858_v1 }
 0x6ee   : > { %v1861_v3 = vsel %vm1859_vm3, %v1860_v2, %v1858_v1 }
 0x6ef   : > { %v1862_v4 = vadd.f32 1.0, %v1861_v3 }
 0x6f1   : > { %v1863_v5 = vmul.f32 %v1862_v4, %v1824_v40 }
 0x6f3   : > { %2234 = vmatmul.msk.f32.vlgmr.msrb.gmra.mxu3 %vm1876_vm4, %v1863_v5 }
 0x776   : > { %v1897_v7 = vpop.f32.mrf.mxu3 }
 0x777   : > { %v1898_v8 = vadd.f32 %v2562_v6, %v1897_v7 }
 0x779   : > { %v1900_v9 = vadd.f32 %v1898_v8, %v3745_v26 }
 0x77b   : > { %v1901_v11 = vsel %vm1003_vm2, %v1900_v9, 0.0 }
 0x77c   : > { %1902 = vadd.xlane.f32.xlu0 %v1901_v11 }
 0x7ef   : > { %v1903_v12 = vpop.xlane.xlu0 %1902 }
 0x7f0   : > { %v1904_v13 = vmul.f32 %v1903_v12, %v3740_v0 }
 0x7f2   : > { %v1905_v14 = vsub.f32 %v1900_v9, %v1904_v13 }
 0x7f4   : > { %v1906_v15 = vmul.f32 %v1905_v14, %v1905_v14 }
 0x7f6   : > { %v1907_v16 = vsel %vm1003_vm2, %v1906_v15, 0.0 }
 0x7f7   : > { %1908 = vadd.xlane.f32.xlu0 %v1907_v16 }
 0x86a   : > { %v1909_v17 = vpop.xlane.xlu0 %1908 }
 0x86b   : > { %v1910_v18 = vmul.f32 %v1909_v17, %v3740_v0 }
 0x86d   : > { %v1911_v19 = vadd.f32 1e-06, %v1910_v18 }
 0x86f   : > { %2589 = vrsqrt.f32 %v1911_v19  ;;  %vm1918_vm6 = vweird.f32 %v1911_v19 }
 0x875   : > { %v2590_v21 = vpop.eup %2589 }
 0x876   : > { %v1913_v22 = vmul.f32 %v2590_v21, %v1911_v19  ;;  %vm1919_vm5 = vweird.f32 %v2590_v21 }
 0x877   : > { %vm1920_vm7 = vmor %vm1918_vm6, %vm1919_vm5 }
 0x878   : > { %v1914_v23 = vmul.f32 %v2590_v21, %v1913_v22 }
 0x87a   : > { %v1915_v24 = vmul.f32 0.5, %v1914_v23 }
 0x87c   : > { %v1916_v26 = vsub.f32 1.5, %v1915_v24 }
 0x87e   : > { %v1917_v27 = vmul.f32 %v2590_v21, %v1916_v26 }
 0x880   : > { %v1921_v0 = vsel %vm1920_vm7, %v2590_v21, %v1917_v27 }
 0x881   : > { %v1922_v29 = vmul.f32 %v1921_v0, %v1905_v14 }
 0x883   : > { %v1927_v33 = vmul.f32 %v2563_v28, %v1922_v29 }
 0x885   : > { %v1932_v35 = vadd.f32 %v2564_v30, %v1927_v33 }
 0x887   : > { %1933 = vst.msk [vmem:[%s890_s28] sm:$0xff] %vm1003_vm2, %v1932_v35 }
 0x888   : > { %2949 = shalt.err (!%p2946_p12)
}
 0x889   : > { %2389 = dma.vmem_to_hbm [thread:$0]  (%p3227_p3), %s1950_s2, 128, %s1952_s21, %s1935_s26  }
 0x88a PF: > { %s3930_s5 = sld [smem:[#allocation35_spill]] }
 0x88b   : > { %s3931_s28 = sld [smem:[#allocation31_spill]] }
 0x890   : > { %p2451_p13 = scmp.ge.s32.totalorder %s3930_s5, 2 }
 0x891   : > { %s1963_s1 = sand.u32 1, %s3931_s28  }
 0x892   : > { %p2426_p0 = pnand %p2451_p13, %p3236_p8  ;;  %s1964_s4 = scalar_lea.sflag [#allocation7], %s1963_s1 }
 0x894   : > { %p2427_p1 = pneg %p2426_p0 }
 0x896   : > { %3007 = dma.done.wait (%p2427_p1), %s1964_s4, 128  }
 0x897   : > { %3009 = vsyncadd (%p2427_p1), %s1964_s4, 4294967168  ;;  %s40_s0 = sadd.s32 1, %s3930_s5   ;;  %s3933_s11 = sld [smem:[#allocation32_spill]] }
 0x898   : > { %p37_p2 = scmp.ge.s32.totalorder %s40_s0, 6   ;;  %s3934_s26 = sld [smem:[#allocation40_spill]] }
 0x899   : > { %s3935_s27 = sld [smem:[#allocation33_spill]]  ;;  %s3939_s2 = smov %s3016_s25 }
 0x89a   : > { %s3936_s3 = sld [smem:[#allocation34_spill]]  ;;  %39 = sbr.rel (!%p37_p2) target bundleno = 29 (0x1d), region = 197 }
 0x89b   : > { %s3937_s28 = sld [smem:[#allocation36_spill]] }
 0x89c   : > { %s3938_s29 = sld [smem:[#allocation38_spill]] }
 0x89d   : > { %s3940_s25 = smov %s3933_s11 }
 0x89f   :  { %1970 = vsyncpa [#allocation6], 1 }
 0x8a0   :  { %1972 = vsyncpa [#allocation6 + $0x1], 1 }
 0x8a1   :  { %1973 = vsyncpa [#allocation9], 1 }
 0x8a2   :  { %1974 = vsyncpa [#allocation12], 1 }
 0x8a3   :  { %1975 = vsyncpa [#allocation15], 1 }
 0x8a4   :  { %1976 = vsyncpa [#allocation18], 1 }
 0x8a5   :  { %1977 = vsyncpa [#allocation21], 1 }
 0x8a6   :  { %1978 = vsyncpa [#allocation7], 1 }
 0x8a7   :  { %1980 = vsyncpa [#allocation7 + $0x1], 1 }

</bundles_post_ra>
